<compile_context>
chip_gen: v7x
topology: tpu7x:2x2x1
jax: 0.10.0
libtpu: 0.0.40
codegen_flags: <defaults>
</compile_context>

<pallas_src>
import jax
import jax.numpy as jnp
from jax.experimental import pallas as pl
from jax.experimental.pallas import tpu as pltpu

BN_EPS = 1e-5


def mlp_encoder_kernel(x_ref, w1_ref, w2_ref, w3_ref, w4_ref, vecs_ref, out_ref):
    hidden = w1_ref.shape[1]     # layer-1 activation width
    wide = w2_ref.shape[1]       # 2*proj_dim: lane-dense width of layers 2-4

    # Packed per-feature vectors (f32): rows = [g1, be1, g2, be2, b3, b4(shifted), 0, 0].
    vecs = vecs_ref[...]
    g1, be1 = vecs[0:1, :hidden], vecs[1:2, :hidden]
    g2, be2 = vecs[2:3, :wide], vecs[3:4, :wide]
    b3, b4 = vecs[4:5, :wide], vecs[5:6, :wide]

    # ---- backbone: Linear(input_dim, hidden) -> BN(train) -> ReLU ----
    # Linear bias cancels exactly under BN mean subtraction, so it is folded away.
    x = x_ref[...].astype(jnp.bfloat16)            # no-op if caller already feeds bf16
    s1 = jnp.dot(x, w1_ref[...], preferred_element_type=jnp.float32)
    mu1 = jnp.mean(s1, axis=0, keepdims=True)
    var1 = jnp.mean((s1 - mu1) * (s1 - mu1), axis=0, keepdims=True)   # biased variance
    a1 = g1 * jax.lax.rsqrt(var1 + BN_EPS)
    c1 = be1 - mu1 * a1
    y1 = jnp.maximum(s1 * a1 + c1, 0.0)

    # ---- backbone: Linear(hidden, proj) -> BN(train) -> ReLU, full 128-lane width ----
    # Columns >= proj of w2 / g2 / be2 are exactly zero -> those lanes of h stay 0.
    s2 = jnp.dot(y1.astype(jnp.bfloat16), w2_ref[...],
                 preferred_element_type=jnp.float32)
    mu2 = jnp.mean(s2, axis=0, keepdims=True)
    var2 = jnp.mean((s2 - mu2) * (s2 - mu2), axis=0, keepdims=True)
    a2 = g2 * jax.lax.rsqrt(var2 + BN_EPS)
    c2 = be2 - mu2 * a2
    h = jnp.maximum(s2 * a2 + c2, 0.0)             # [ h | 0 ]

    # ---- projector: Linear(proj, proj) -> ReLU -> Linear(proj, proj) ----
    # Weight placement gives  z1 = [ReLU(h@w3 + b3) | 0]  and  z = [0 | z1@w4 + b4].
    z1 = jnp.maximum(
        jnp.dot(h.astype(jnp.bfloat16), w3_ref[...],
                preferred_element_type=jnp.float32) + b3,
        0.0)
    z = jnp.dot(z1.astype(jnp.bfloat16), w4_ref[...],
                preferred_element_type=jnp.float32) + b4

    # Lane-dense [h | z] store with no concatenate / lane rotate.
    out_ref[...] = (h + z).astype(out_ref.dtype)


def mlp_encoder_forward(x, params):
    """x: (B, input_dim).  Returns (h, z) in bf16, like MLPEncoder.forward."""
    B, input_dim = x.shape
    hidden = params["w1"].shape[1]
    proj = params["w2"].shape[1]
    wide = 2 * proj
    assert hidden % 128 == 0 and wide % 128 == 0 and B % 8 == 0

    # ---- layout plumbing at the call boundary (no compute hoisting) ----
    w1 = params["w1"].astype(jnp.bfloat16)
    w2w = jnp.zeros((hidden, wide), jnp.bfloat16).at[:, :proj].set(
        params["w2"].astype(jnp.bfloat16))
    w3w = jnp.zeros((wide, wide), jnp.bfloat16).at[:proj, :proj].set(
        params["w3"].astype(jnp.bfloat16))
    w4w = jnp.zeros((wide, wide), jnp.bfloat16).at[:proj, proj:].set(
        params["w4"].astype(jnp.bfloat16))

    W = max(hidden, wide)

    def row(v, off=0):
        return jnp.zeros((1, W), jnp.float32).at[:, off:off + v.shape[1]].set(v)

    vecs = jnp.concatenate(
        [row(params["g1"]), row(params["be1"]),
         row(params["g2"]), row(params["be2"]),
         row(params["b3"]), row(params["b4"], off=proj),
         jnp.zeros((2, W), jnp.float32)],
        axis=0,
    )  # (8, W) f32

    flops = 2 * B * (input_dim * hidden + hidden * wide + 2 * wide * wide)
    bytes_accessed = (x.size * x.dtype.itemsize
                      + 2 * (w1.size + w2w.size + w3w.size + w4w.size)
                      + 4 * vecs.size
                      + 2 * B * wide)

    vmem = pl.BlockSpec(memory_space=pltpu.MemorySpace.VMEM)
    out = pl.pallas_call(
        mlp_encoder_kernel,
        out_shape=jax.ShapeDtypeStruct((B, wide), jnp.bfloat16),
        in_specs=[vmem] * 6,
        out_specs=vmem,
        cost_estimate=pl.CostEstimate(
            flops=flops,
            transcendentals=hidden + wide,          # rsqrt per BN feature
            bytes_accessed=bytes_accessed,
        ),
    )(x, w1, w2w, w3w, w4w, vecs)

    return out[:, :proj], out[:, proj:]


def init_params(key, input_dim, hidden_dim=128, proj_dim=64):
    """Deterministic synthetic parameters (PyTorch-like, weights stored (in, out))."""
    ks = jax.random.split(key, 8)
    scale = 0.05
    return {
        # backbone Linear 1 + BN 1
        "w1": scale * jax.random.normal(ks[0], (input_dim, hidden_dim), jnp.float32),
        "b1": scale * jax.random.normal(ks[1], (1, hidden_dim), jnp.float32),
        "g1": jnp.ones((1, hidden_dim), jnp.float32),
        "be1": jnp.zeros((1, hidden_dim), jnp.float32),
        # backbone Linear 2 + BN 2
        "w2": scale * jax.random.normal(ks[2], (hidden_dim, proj_dim), jnp.float32),
        "b2": scale * jax.random.normal(ks[3], (1, proj_dim), jnp.float32),
        "g2": jnp.ones((1, proj_dim), jnp.float32),
        "be2": jnp.zeros((1, proj_dim), jnp.float32),
        # projector Linear 1
        "w3": scale * jax.random.normal(ks[4], (proj_dim, proj_dim), jnp.float32),
        "b3": scale * jax.random.normal(ks[5], (1, proj_dim), jnp.float32),
        # projector Linear 2
        "w4": scale * jax.random.normal(ks[6], (proj_dim, proj_dim), jnp.float32),
        "b4": scale * jax.random.normal(ks[7], (1, proj_dim), jnp.float32),
    }


def reference_forward(x, p, matmul_dtype=jnp.float32):
    """Plain-JAX reference of MLPEncoder (training-mode BN).  matmul_dtype=bf16 gives
    the precision-matched reference for the bf16-MXU kernel."""
    def dot(a, b):
        return jnp.dot(a.astype(matmul_dtype), b.astype(matmul_dtype),
                       preferred_element_type=jnp.float32)

    def bn(y, g, be):
        mu = jnp.mean(y, axis=0, keepdims=True)
        var = jnp.mean((y - mu) ** 2, axis=0, keepdims=True)
        return (y - mu) * jax.lax.rsqrt(var + BN_EPS) * g + be

    y = dot(x, p["w1"]) + p["b1"]
    y = jnp.maximum(bn(y, p["g1"], p["be1"]), 0.0)
    y = dot(y, p["w2"]) + p["b2"]
    h = jnp.maximum(bn(y, p["g2"], p["be2"]), 0.0)
    z = jnp.maximum(dot(h, p["w3"]) + p["b3"], 0.0)
    z = dot(z, p["w4"]) + p["b4"]
    return h, z


if __name__ == "__main__":
    # Module defaults (hidden=128, proj=64) with a small input_dim and a batch that is a
    # multiple of 8 (sublane alignment for the axis-0 BN reductions).
    B, INPUT_DIM, HIDDEN_DIM, PROJ_DIM = 256, 32, 128, 64

    key = jax.random.PRNGKey(0)
    kx, kp = jax.random.split(key)
    x = jax.random.normal(kx, (B, INPUT_DIM), jnp.float32)
    params = init_params(kp, INPUT_DIM, HIDDEN_DIM, PROJ_DIM)

    h, z = mlp_encoder_forward(x, params)
    h = jax.block_until_ready(h)
    z = jax.block_until_ready(z)

    # Precision-matched reference (bf16 MXU inputs, f32 accumulation / BN / ReLU).
    h_ref, z_ref = reference_forward(x, params, matmul_dtype=jnp.bfloat16)

    assert h.shape == (B, PROJ_DIM) and z.shape == (B, PROJ_DIM)
    assert jnp.allclose(h.astype(jnp.float32), h_ref, atol=3e-2, rtol=3e-2)
    assert jnp.allclose(z.astype(jnp.float32), z_ref, atol=3e-2, rtol=3e-2)

    print("KERNEL_OK")
</pallas_src>

<mosaic_0001>
module attributes {stable_mosaic.version = 11 : i64} {
  func.func @mlp_encoder_kernel(%arg0: memref<256x32xf32, #tpu.memory_space<vmem>>, %arg1: memref<32x128xbf16, #tpu.memory_space<vmem>>, %arg2: memref<128x128xbf16, #tpu.memory_space<vmem>>, %arg3: memref<128x128xbf16, #tpu.memory_space<vmem>>, %arg4: memref<128x128xbf16, #tpu.memory_space<vmem>>, %arg5: memref<8x128xf32, #tpu.memory_space<vmem>>, %arg6: memref<256x128xbf16, #tpu.memory_space<vmem>>) attributes {dimension_semantics = [], scalar_prefetch = 0 : i64, scratch_operands = 0 : i64, tpu.core_type = #tpu.core_type<tc>} {
    %c0 = arith.constant 0 : index
    %c0_0 = arith.constant 0 : index
    %0 = vector.load %arg5[%c0, %c0_0] : memref<8x128xf32, #tpu.memory_space<vmem>>, vector<8x128xf32>
    %1 = vector.extract_strided_slice %0 {offsets = [0, 0], sizes = [1, 128], strides = [1, 1]} : vector<8x128xf32> to vector<1x128xf32>
    %2 = vector.extract_strided_slice %0 {offsets = [1, 0], sizes = [1, 128], strides = [1, 1]} : vector<8x128xf32> to vector<1x128xf32>
    %3 = vector.extract_strided_slice %0 {offsets = [2, 0], sizes = [1, 128], strides = [1, 1]} : vector<8x128xf32> to vector<1x128xf32>
    %4 = vector.extract_strided_slice %0 {offsets = [3, 0], sizes = [1, 128], strides = [1, 1]} : vector<8x128xf32> to vector<1x128xf32>
    %5 = vector.extract_strided_slice %0 {offsets = [4, 0], sizes = [1, 128], strides = [1, 1]} : vector<8x128xf32> to vector<1x128xf32>
    %6 = vector.extract_strided_slice %0 {offsets = [5, 0], sizes = [1, 128], strides = [1, 1]} : vector<8x128xf32> to vector<1x128xf32>
    %c0_1 = arith.constant 0 : index
    %c0_2 = arith.constant 0 : index
    %7 = vector.load %arg0[%c0_1, %c0_2] : memref<256x32xf32, #tpu.memory_space<vmem>>, vector<256x32xf32>
    %8 = arith.truncf %7 : vector<256x32xf32> to vector<256x32xbf16>
    %c0_3 = arith.constant 0 : index
    %c0_4 = arith.constant 0 : index
    %9 = vector.load %arg1[%c0_3, %c0_4] : memref<32x128xbf16, #tpu.memory_space<vmem>>, vector<32x128xbf16>
    %cst = arith.constant dense<0.000000e+00> : vector<256x128xf32>
    %10 = tpu.matmul %8, %9, %cst {dimension_numbers = #tpu.dot_dimension_numbers<[1], [0], [0], [1], [0, 0, 1, 1], [], []>} : vector<256x32xbf16>, vector<32x128xbf16>, vector<256x128xf32> -> vector<256x128xf32>
    %cst_5 = arith.constant dense<0.000000e+00> : vector<128xf32>
    %11 = vector.multi_reduction <add>, %10, %cst_5 [0] : vector<256x128xf32> to vector<128xf32>
    %12 = vector.shape_cast %11 : vector<128xf32> to vector<1x128xf32>
    %cst_6 = arith.constant 2.560000e+02 : f32
    %13 = vector.broadcast %cst_6 : f32 to vector<1x128xf32>
    %14 = arith.divf %12, %13 : vector<1x128xf32>
    %15 = vector.broadcast %14 : vector<1x128xf32> to vector<256x128xf32>
    %16 = arith.subf %10, %15 : vector<256x128xf32>
    %17 = vector.broadcast %14 : vector<1x128xf32> to vector<256x128xf32>
    %18 = arith.subf %10, %17 : vector<256x128xf32>
    %19 = arith.mulf %16, %18 : vector<256x128xf32>
    %cst_7 = arith.constant dense<0.000000e+00> : vector<128xf32>
    %20 = vector.multi_reduction <add>, %19, %cst_7 [0] : vector<256x128xf32> to vector<128xf32>
    %21 = vector.shape_cast %20 : vector<128xf32> to vector<1x128xf32>
    %cst_8 = arith.constant 2.560000e+02 : f32
    %22 = vector.broadcast %cst_8 : f32 to vector<1x128xf32>
    %23 = arith.divf %21, %22 : vector<1x128xf32>
    %cst_9 = arith.constant 9.99999974E-6 : f32
    %24 = vector.broadcast %cst_9 : f32 to vector<1x128xf32>
    %25 = arith.addf %23, %24 : vector<1x128xf32>
    %26 = math.rsqrt %25 : vector<1x128xf32>
    %27 = arith.mulf %1, %26 : vector<1x128xf32>
    %28 = arith.mulf %14, %27 : vector<1x128xf32>
    %29 = arith.subf %2, %28 : vector<1x128xf32>
    %30 = vector.broadcast %27 : vector<1x128xf32> to vector<256x128xf32>
    %31 = arith.mulf %10, %30 : vector<256x128xf32>
    %32 = vector.broadcast %29 : vector<1x128xf32> to vector<256x128xf32>
    %33 = arith.addf %31, %32 : vector<256x128xf32>
    %cst_10 = arith.constant 0.000000e+00 : f32
    %34 = vector.broadcast %cst_10 : f32 to vector<256x128xf32>
    %35 = arith.maximumf %33, %34 : vector<256x128xf32>
    %36 = arith.truncf %35 : vector<256x128xf32> to vector<256x128xbf16>
    %c0_11 = arith.constant 0 : index
    %c0_12 = arith.constant 0 : index
    %37 = vector.load %arg2[%c0_11, %c0_12] : memref<128x128xbf16, #tpu.memory_space<vmem>>, vector<128x128xbf16>
    %cst_13 = arith.constant dense<0.000000e+00> : vector<256x128xf32>
    %38 = tpu.matmul %36, %37, %cst_13 {dimension_numbers = #tpu.dot_dimension_numbers<[1], [0], [0], [1], [0, 0, 1, 1], [], []>} : vector<256x128xbf16>, vector<128x128xbf16>, vector<256x128xf32> -> vector<256x128xf32>
    %cst_14 = arith.constant dense<0.000000e+00> : vector<128xf32>
    %39 = vector.multi_reduction <add>, %38, %cst_14 [0] : vector<256x128xf32> to vector<128xf32>
    %40 = vector.shape_cast %39 : vector<128xf32> to vector<1x128xf32>
    %cst_15 = arith.constant 2.560000e+02 : f32
    %41 = vector.broadcast %cst_15 : f32 to vector<1x128xf32>
    %42 = arith.divf %40, %41 : vector<1x128xf32>
    %43 = vector.broadcast %42 : vector<1x128xf32> to vector<256x128xf32>
    %44 = arith.subf %38, %43 : vector<256x128xf32>
    %45 = vector.broadcast %42 : vector<1x128xf32> to vector<256x128xf32>
    %46 = arith.subf %38, %45 : vector<256x128xf32>
    %47 = arith.mulf %44, %46 : vector<256x128xf32>
    %cst_16 = arith.constant dense<0.000000e+00> : vector<128xf32>
    %48 = vector.multi_reduction <add>, %47, %cst_16 [0] : vector<256x128xf32> to vector<128xf32>
    %49 = vector.shape_cast %48 : vector<128xf32> to vector<1x128xf32>
    %cst_17 = arith.constant 2.560000e+02 : f32
    %50 = vector.broadcast %cst_17 : f32 to vector<1x128xf32>
    %51 = arith.divf %49, %50 : vector<1x128xf32>
    %cst_18 = arith.constant 9.99999974E-6 : f32
    %52 = vector.broadcast %cst_18 : f32 to vector<1x128xf32>
    %53 = arith.addf %51, %52 : vector<1x128xf32>
    %54 = math.rsqrt %53 : vector<1x128xf32>
    %55 = arith.mulf %3, %54 : vector<1x128xf32>
    %56 = arith.mulf %42, %55 : vector<1x128xf32>
    %57 = arith.subf %4, %56 : vector<1x128xf32>
    %58 = vector.broadcast %55 : vector<1x128xf32> to vector<256x128xf32>
    %59 = arith.mulf %38, %58 : vector<256x128xf32>
    %60 = vector.broadcast %57 : vector<1x128xf32> to vector<256x128xf32>
    %61 = arith.addf %59, %60 : vector<256x128xf32>
    %cst_19 = arith.constant 0.000000e+00 : f32
    %62 = vector.broadcast %cst_19 : f32 to vector<256x128xf32>
    %63 = arith.maximumf %61, %62 : vector<256x128xf32>
    %64 = arith.truncf %63 : vector<256x128xf32> to vector<256x128xbf16>
    %c0_20 = arith.constant 0 : index
    %c0_21 = arith.constant 0 : index
    %65 = vector.load %arg3[%c0_20, %c0_21] : memref<128x128xbf16, #tpu.memory_space<vmem>>, vector<128x128xbf16>
    %cst_22 = arith.constant dense<0.000000e+00> : vector<256x128xf32>
    %66 = tpu.matmul %64, %65, %cst_22 {dimension_numbers = #tpu.dot_dimension_numbers<[1], [0], [0], [1], [0, 0, 1, 1], [], []>} : vector<256x128xbf16>, vector<128x128xbf16>, vector<256x128xf32> -> vector<256x128xf32>
    %67 = vector.broadcast %5 : vector<1x128xf32> to vector<256x128xf32>
    %68 = arith.addf %66, %67 : vector<256x128xf32>
    %cst_23 = arith.constant 0.000000e+00 : f32
    %69 = vector.broadcast %cst_23 : f32 to vector<256x128xf32>
    %70 = arith.maximumf %68, %69 : vector<256x128xf32>
    %71 = arith.truncf %70 : vector<256x128xf32> to vector<256x128xbf16>
    %c0_24 = arith.constant 0 : index
    %c0_25 = arith.constant 0 : index
    %72 = vector.load %arg4[%c0_24, %c0_25] : memref<128x128xbf16, #tpu.memory_space<vmem>>, vector<128x128xbf16>
    %cst_26 = arith.constant dense<0.000000e+00> : vector<256x128xf32>
    %73 = tpu.matmul %71, %72, %cst_26 {dimension_numbers = #tpu.dot_dimension_numbers<[1], [0], [0], [1], [0, 0, 1, 1], [], []>} : vector<256x128xbf16>, vector<128x128xbf16>, vector<256x128xf32> -> vector<256x128xf32>
    %74 = vector.broadcast %6 : vector<1x128xf32> to vector<256x128xf32>
    %75 = arith.addf %73, %74 : vector<256x128xf32>
    %76 = arith.addf %63, %75 : vector<256x128xf32>
    %77 = arith.truncf %76 : vector<256x128xf32> to vector<256x128xbf16>
    %c0_27 = arith.constant 0 : index
    %c0_28 = arith.constant 0 : index
    %78 = vector.load %arg6[%c0_27, %c0_28] : memref<256x128xbf16, #tpu.memory_space<vmem>>, vector<256x128xbf16>
    tpu.vector_store %arg6[%c0_27, %c0_28], %77 {strides = array<i32>} : memref<256x128xbf16, #tpu.memory_space<vmem>>, vector<256x128xbf16>,
    return
  }
}

</mosaic_0001>

<bundles_post_ra>
// kernel: tpu_custom_call.1
= control target key start
LH: loop header
LB: loop body
LE: loop exit
PB: predicated region body
PF: predicated region fallthrough
CT: control target
= control target key end

     0   :  { %vm90_vm0 = vcmask 261120   ;;  %s3312_s0 = inlined_call_operand.vmem [shape: f32[256,32], index: 0, kind: input, shape index: {}]   ;;  %s3313_s1 = inlined_call_operand.vmem [shape: bf16[32,128], index: 1, kind: input, shape index: {}]   ;;  %s3314_s2 = inlined_call_operand.vmem [shape: bf16[128,128], index: 2, kind: input, shape index: {}]   ;;  %s3315_s3 = inlined_call_operand.vmem [shape: bf16[128,128], index: 3, kind: input, shape index: {}]   ;;  %s3316_s4 = inlined_call_operand.vmem [shape: bf16[128,128], index: 4, kind: input, shape index: {}]   ;;  %s3317_s5 = inlined_call_operand.vmem [shape: f32[8,128], index: 5, kind: input, shape index: {}]   ;;  %s3318_s6 = inlined_call_operand.hbm [shape: bf16[256,128], index: 6, kind: output, shape index: {}]  }
   0x1   :  { %v2266_v0 = vld [vmem:[%s3313_s1] sm:$0xff]   ;;  %v2267_v1 = vld [vmem:[%s3313_s1 + $0x8] sm:$0xff]   ;;  %v28_v5 = vld [vmem:[%s3312_s0 + $0x10] sm:$0xff] }
   0x2   :  { %2067 = vmatprep.subr.bf16.mxu0 %v2266_v0  ;;  %v26_v2 = vld [vmem:[%s3312_s0] sm:$0xff]  ;;  %v27_v3 = vld [vmem:[%s3312_s0 + $0x8] sm:$0xff]  ;;  %v29_v6 = vld [vmem:[%s3312_s0 + $0x18] sm:$0xff] }
   0x3   :  { %2068 = vmatpush3.bf16.msra.mxu0 %v2266_v0  ;;  %v58_v4 = vpack.c.bf16 %v27_v3, %v26_v2  ;;  %v30_v7 = vld [vmem:[%s3312_s0 + $0x20] sm:$0xff]  ;;  %v31_v8 = vld [vmem:[%s3312_s0 + $0x28] sm:$0xff]  ;;  %v59_v9 = vpack.c.bf16 %v29_v6, %v28_v5  ;;  %v32_v11 = vld [vmem:[%s3312_s0 + $0x30] sm:$0xff] }
   0x4   :  { %2069 = vmatprep.subr.bf16.mxu0 %v2267_v1  ;;  %v60_v10 = vpack.c.bf16 %v31_v8, %v30_v7  ;;  %v33_v12 = vld [vmem:[%s3312_s0 + $0x38] sm:$0xff]  ;;  %v34_v13 = vld [vmem:[%s3312_s0 + $0x40] sm:$0xff]  ;;  %v35_v14 = vld [vmem:[%s3312_s0 + $0x48] sm:$0xff] }
   0x5   :  { %2071 = vmatprep.mubr.msk.bf16.mxu0 %vm90_vm0, %v58_v4  ;;  %v61_v15 = vpack.c.bf16 %v33_v12, %v32_v11  ;;  %v62_v16 = vpack.c.bf16 %v35_v14, %v34_v13  ;;  %v36_v17 = vld [vmem:[%s3312_s0 + $0x50] sm:$0xff]  ;;  %v37_v18 = vld [vmem:[%s3312_s0 + $0x58] sm:$0xff]  ;;  %v38_v19 = vld [vmem:[%s3312_s0 + $0x60] sm:$0xff] }
   0x6   :  { %v39_v20 = vld [vmem:[%s3312_s0 + $0x68] sm:$0xff]  ;;  %v63_v21 = vpack.c.bf16 %v37_v18, %v36_v17  ;;  %v40_v23 = vld [vmem:[%s3312_s0 + $0x70] sm:$0xff]  ;;  %v41_v24 = vld [vmem:[%s3312_s0 + $0x78] sm:$0xff] }
   0x7   :  { %2070 = vmatpush3.bf16.msra.mxu0 %v2267_v1  ;;  %v64_v22 = vpack.c.bf16 %v39_v20, %v38_v19  ;;  %v42_v25 = vld [vmem:[%s3312_s0 + $0x80] sm:$0xff]  ;;  %v43_v26 = vld [vmem:[%s3312_s0 + $0x88] sm:$0xff] }
   0xa   :  { %2072 = vmatmul.mubr.msk.bf16.vlgmr.msra.gmra.mrb[0].mxu0 %vm90_vm0, %v59_v9 }
   0xb   :  { %2075 = vmatprep.mubr.msk.bf16.mxu0 %vm90_vm0, %v60_v10 }
  0x12   :  { %2076 = vmatmul.mubr.msk.bf16.gmra.mrb[4].mxu0 %vm90_vm0, %v61_v15 }
  0x13   :  { %2079 = vmatprep.mubr.msk.bf16.mxu0 %vm90_vm0, %v62_v16 }
  0x1a   :  { %2080 = vmatmul.mubr.msk.bf16.gmra.mrb[8].mxu0 %vm90_vm0, %v63_v21 }
  0x1b   :  { %2083 = vmatprep.mubr.msk.bf16.mxu0 %vm90_vm0, %v64_v22 }
  0x1c   :  { %11 = vsyncpa [#allocation3], 0  ;;  %v65_v27 = vpack.c.bf16 %v41_v24, %v40_v23  ;;  %v66_v28 = vpack.c.bf16 %v43_v26, %v42_v25  ;;  %v44_v29 = vld [vmem:[%s3312_s0 + $0x90] sm:$0xff]  ;;  %v45_v30 = vld [vmem:[%s3312_s0 + $0x98] sm:$0xff] }
  0x1d   :  { %v46_v31 = vld [vmem:[%s3312_s0 + $0xa0] sm:$0xff]  ;;  %v47_v32 = vld [vmem:[%s3312_s0 + $0xa8] sm:$0xff]  ;;  %v67_v33 = vpack.c.bf16 %v45_v30, %v44_v29  ;;  %v48_v35 = vld [vmem:[%s3312_s0 + $0xb0] sm:$0xff] }
  0x1e   :  { %v68_v34 = vpack.c.bf16 %v47_v32, %v46_v31  ;;  %v49_v36 = vld [vmem:[%s3312_s0 + $0xb8] sm:$0xff]  ;;  %v50_v37 = vld [vmem:[%s3312_s0 + $0xc0] sm:$0xff]  ;;  %v51_v38 = vld [vmem:[%s3312_s0 + $0xc8] sm:$0xff] }
  0x1f   :  { %v69_v39 = vpack.c.bf16 %v49_v36, %v48_v35  ;;  %v70_v40 = vpack.c.bf16 %v51_v38, %v50_v37  ;;  %v52_v41 = vld [vmem:[%s3312_s0 + $0xd0] sm:$0xff]  ;;  %v53_v42 = vld [vmem:[%s3312_s0 + $0xd8] sm:$0xff]  ;;  %v54_v43 = vld [vmem:[%s3312_s0 + $0xe0] sm:$0xff] }
  0x20   :  { %v55_v44 = vld [vmem:[%s3312_s0 + $0xe8] sm:$0xff]  ;;  %v71_v45 = vpack.c.bf16 %v53_v42, %v52_v41  ;;  %v56_v47 = vld [vmem:[%s3312_s0 + $0xf0] sm:$0xff]  ;;  %v57_v48 = vld [vmem:[%s3312_s0 + $0xf8] sm:$0xff] }
  0x21   :  { %v72_v46 = vpack.c.bf16 %v55_v44, %v54_v43  ;;  %v73_v49 = vpack.c.bf16 %v57_v48, %v56_v47  ;;  %v2268_v37 = vld [vmem:[%s3314_s2] sm:$0xff]   ;;  %v2269_v41 = vld [vmem:[%s3314_s2 + $0x8] sm:$0xff]   ;;  %v2270_v47 = vld [vmem:[%s3314_s2 + $0x10] sm:$0xff]  }
  0x22   :  { %2084 = vmatmul.mubr.msk.bf16.gmra.mrb[12].mxu0 %vm90_vm0, %v65_v27  ;;  %2103 = vmatprep.subr.bf16.mxu1 %v2268_v37 }
  0x23   :  { %2087 = vmatprep.mubr.msk.bf16.mxu0 %vm90_vm0, %v66_v28  ;;  %2104 = vmatpush3.bf16.msra.mxu1 %v2268_v37 }
  0x24   :  { %2105 = vmatprep.subr.bf16.mxu1 %v2269_v41 }
  0x27   :  { %2106 = vmatpush3.bf16.msra.mxu1 %v2269_v41 }
  0x28   :  { %2107 = vmatprep.subr.bf16.mxu1 %v2270_v47 }
  0x2a   :  { %2088 = vmatmul.mubr.msk.bf16.gmra.mrb[16].mxu0 %vm90_vm0, %v67_v33 }
  0x2b   :  { %2091 = vmatprep.mubr.msk.bf16.mxu0 %vm90_vm0, %v68_v34  ;;  %2108 = vmatpush3.bf16.msra.mxu1 %v2270_v47 }
  0x32   :  { %2092 = vmatmul.mubr.msk.bf16.gmra.mrb[20].mxu0 %vm90_vm0, %v69_v39 }
  0x33   :  { %2095 = vmatprep.mubr.msk.bf16.mxu0 %vm90_vm0, %v70_v40 }
  0x3a   :  { %2096 = vmatmul.mubr.msk.bf16.gmra.mrb[24].mxu0 %vm90_vm0, %v71_v45 }
  0x3b   :  { %2099 = vmatprep.mubr.msk.bf16.mxu0 %vm90_vm0, %v72_v46 }
  0x42   :  { %2100 = vmatmul.mubr.msk.bf16.gmra.mrb[28].mxu0 %vm90_vm0, %v73_v49 }
  0xdd   :  { %v2477_v50 = vpop.f32.mrb[0].mxu0 }
  0xde   :  { %v2479_v51 = vpop.f32.mrb[1].mxu0 }
  0xdf   :  { %v2481_v52 = vpop.f32.mrb[2].mxu0 }
  0xe0   :  { %v2483_v53 = vpop.f32.mrb[3].mxu0 }
  0xe1   :  { %v300_v54 = vadd.f32 %v2483_v53, %v2479_v51 }
  0xe3   :  { %v301_v55 = vadd.f32 %v2477_v50, %v300_v54 }
  0xe5   :  { %v2488_v56 = vpop.f32.mrb[4].mxu0  ;;  %v302_v57 = vadd.f32 %v2481_v52, %v301_v55  ;;  %v2271_v55 = vld [vmem:[%s3314_s2 + $0x18] sm:$0xff]  }
  0xe6   :  { %v2491_v58 = vpop.f32.mrb[5].mxu0  ;;  %2109 = vmatprep.subr.bf16.mxu1 %v2271_v55 }
  0xe7   :  { %v303_v59 = vadd.f32 %v302_v57, %v2491_v58  ;;  %v2494_v60 = vpop.f32.mrb[6].mxu0  ;;  %2110 = vmatpush3.bf16.msra.mxu1 %v2271_v55 }
  0xe8   :  { %v2496_v61 = vpop.f32.mrb[7].mxu0 }
  0xe9   :  { %v304_v62 = vadd.f32 %v303_v59, %v2496_v61 }
  0xeb   :  { %v305_v63 = vadd.f32 %v2488_v56, %v304_v62  ;;  %v2272_v62 = vld [vmem:[%s3314_s2 + $0x20] sm:$0xff]  }
  0xec   :  { %2111 = vmatprep.subr.bf16.mxu1 %v2272_v62 }
  0xed   :  { %v2500_v0 = vpop.f32.mrb[8].mxu0  ;;  %v306_v1 = vadd.f32 %v2494_v60, %v305_v63  ;;  %2112 = vmatpush3.bf16.msra.mxu1 %v2272_v62 }
  0xee   :  { %v2503_v2 = vpop.f32.mrb[9].mxu0 }
  0xef   :  { %v307_v3 = vadd.f32 %v306_v1, %v2503_v2  ;;  %v2506_v4 = vpop.f32.mrb[10].mxu0 }
  0xf0   :  { %v2508_v5 = vpop.f32.mrb[11].mxu0 }
  0xf1   :  { %v308_v6 = vadd.f32 %v307_v3, %v2508_v5  ;;  %v2273_v3 = vld [vmem:[%s3314_s2 + $0x28] sm:$0xff]  }
  0xf2   :  { %2113 = vmatprep.subr.bf16.mxu1 %v2273_v3 }
  0xf3   :  { %v309_v7 = vadd.f32 %v2500_v0, %v308_v6  ;;  %2114 = vmatpush3.bf16.msra.mxu1 %v2273_v3 }
  0xf5   :  { %v2512_v8 = vpop.f32.mrb[12].mxu0  ;;  %v310_v9 = vadd.f32 %v2506_v4, %v309_v7  ;;  %v2274_v7 = vld [vmem:[%s3314_s2 + $0x30] sm:$0xff]  }
  0xf6   :  { %v2515_v10 = vpop.f32.mrb[13].mxu0  ;;  %2115 = vmatprep.subr.bf16.mxu1 %v2274_v7 }
  0xf7   :  { %v311_v11 = vadd.f32 %v310_v9, %v2515_v10  ;;  %v2518_v12 = vpop.f32.mrb[14].mxu0  ;;  %2116 = vmatpush3.bf16.msra.mxu1 %v2274_v7 }
  0xf8   :  { %v2520_v13 = vpop.f32.mrb[15].mxu0 }
  0xf9   :  { %v312_v14 = vadd.f32 %v311_v11, %v2520_v13  ;;  %v2275_v11 = vld [vmem:[%s3314_s2 + $0x38] sm:$0xff]  }
  0xfa   :  { %2117 = vmatprep.subr.bf16.mxu1 %v2275_v11 }
  0xfb   :  { %v313_v15 = vadd.f32 %v2512_v8, %v312_v14  ;;  %2118 = vmatpush3.bf16.msra.mxu1 %v2275_v11 }
  0xfd   :  { %v2524_v16 = vpop.f32.mrb[16].mxu0  ;;  %v314_v17 = vadd.f32 %v2518_v12, %v313_v15 }
  0xfe   :  { %v2527_v18 = vpop.f32.mrb[17].mxu0 }
  0xff   :  { %v315_v19 = vadd.f32 %v314_v17, %v2527_v18  ;;  %v2530_v20 = vpop.f32.mrb[18].mxu0 }
 0x100   :  { %v2532_v21 = vpop.f32.mrb[19].mxu0 }
 0x101   :  { %v316_v22 = vadd.f32 %v315_v19, %v2532_v21 }
 0x103   :  { %v317_v23 = vadd.f32 %v2524_v16, %v316_v22 }
 0x105   :  { %v2536_v24 = vpop.f32.mrb[20].mxu0  ;;  %v318_v25 = vadd.f32 %v2530_v20, %v317_v23 }
 0x106   :  { %v2539_v26 = vpop.f32.mrb[21].mxu0 }
 0x107   :  { %v319_v27 = vadd.f32 %v318_v25, %v2539_v26  ;;  %v2542_v28 = vpop.f32.mrb[22].mxu0 }
 0x108   :  { %v2544_v29 = vpop.f32.mrb[23].mxu0 }
 0x109   :  { %v320_v30 = vadd.f32 %v319_v27, %v2544_v29 }
 0x10b   :  { %v321_v31 = vadd.f32 %v2536_v24, %v320_v30 }
 0x10d   :  { %v2548_v32 = vpop.f32.mrb[24].mxu0  ;;  %v322_v33 = vadd.f32 %v2542_v28, %v321_v31 }
 0x10e   :  { %v2551_v34 = vpop.f32.mrb[25].mxu0 }
 0x10f   :  { %v323_v35 = vadd.f32 %v322_v33, %v2551_v34  ;;  %v2554_v36 = vpop.f32.mrb[26].mxu0 }
 0x110   :  { %v2559_v38 = vpop.f32.mrb[27].mxu0 }
 0x111   :  { %v324_v39 = vadd.f32 %v323_v35, %v2559_v38 }
 0x113   :  { %v325_v40 = vadd.f32 %v2548_v32, %v324_v39 }
 0x115   :  { %v2566_v42 = vpop.f32.mrb[28].mxu0  ;;  %v326_v43 = vadd.f32 %v2554_v36, %v325_v40 }
 0x116   :  { %v2569_v44 = vpop.f32.mrb[29].mxu0 }
 0x117   :  { %v327_v45 = vadd.f32 %v326_v43, %v2569_v44  ;;  %v2572_v46 = vpop.f32.mrb[30].mxu0 }
 0x118   :  { %v2577_v48 = vpop.f32.mrb[31].mxu0 }
 0x119   :  { %v328_v49 = vadd.f32 %v327_v45, %v2577_v48 }
 0x11b   :  { %v329_v54 = vadd.f32 %v2566_v42, %v328_v49 }
 0x11d   :  { %v330_v57 = vadd.f32 %v2572_v46, %v329_v54 }
 0x11f   :  { %v331_v59 = vrot.slane %v330_v57, 4 }
 0x121   :  { %v332_v63 = vadd.f32 %v331_v59, %v330_v57 }
 0x123   :  { %v333_v1 = vrot.slane %v332_v63, 2 }
 0x125   :  { %v334_v6 = vadd.f32 %v333_v1, %v332_v63 }
 0x127   :  { %v335_v9 = vrot.slane %v334_v6, 1 }
 0x129   :  { %v336_v14 = vadd.f32 %v335_v9, %v334_v6 }
 0x12b   :  { %v2597_v15 = vmul.f32 0.00390625, %v336_v14 }
 0x12d   :  { %v339_v17 = vsub.f32 %v2479_v51, %v2597_v15  ;;  %v340_v19 = vsub.f32 %v2483_v53, %v2597_v15  ;;  %v341_v22 = vsub.f32 %v2477_v50, %v2597_v15  ;;  %v342_v27 = vsub.f32 %v2481_v52, %v2597_v15 }
 0x12e   :  { %v343_v30 = vsub.f32 %v2491_v58, %v2597_v15  ;;  %v344_v35 = vsub.f32 %v2496_v61, %v2597_v15  ;;  %v345_v40 = vsub.f32 %v2488_v56, %v2597_v15  ;;  %v346_v45 = vsub.f32 %v2494_v60, %v2597_v15 }
 0x12f   :  { %v371_v23 = vmul.f32 %v339_v17, %v339_v17  ;;  %v372_v25 = vmul.f32 %v340_v19, %v340_v19  ;;  %v373_v31 = vmul.f32 %v341_v22, %v341_v22  ;;  %v374_v37 = vmul.f32 %v342_v27, %v342_v27 }
 0x130   :  { %v375_v41 = vmul.f32 %v343_v30, %v343_v30  ;;  %v376_v47 = vmul.f32 %v344_v35, %v344_v35  ;;  %v347_v54 = vsub.f32 %v2503_v2, %v2597_v15  ;;  %v377_v55 = vmul.f32 %v345_v40, %v345_v40 }
 0x131   :  { %v403_v33 = vadd.f32 %v372_v25, %v371_v23  ;;  %v348_v59 = vsub.f32 %v2508_v5, %v2597_v15  ;;  %v378_v62 = vmul.f32 %v346_v45, %v346_v45  ;;  %v349_v1 = vsub.f32 %v2500_v0, %v2597_v15 }
 0x132   :  { %v379_v3 = vmul.f32 %v347_v54, %v347_v54  ;;  %v350_v7 = vsub.f32 %v2506_v4, %v2597_v15  ;;  %v351_v14 = vsub.f32 %v2515_v10, %v2597_v15  ;;  %v352_v22 = vsub.f32 %v2520_v13, %v2597_v15 }
 0x133   :  { %v404_v39 = vadd.f32 %v403_v33, %v373_v31  ;;  %v380_v9 = vmul.f32 %v348_v59, %v348_v59  ;;  %v381_v17 = vmul.f32 %v349_v1, %v349_v1  ;;  %v353_v27 = vsub.f32 %v2512_v8, %v2597_v15 }
 0x134   :  { %v382_v23 = vmul.f32 %v350_v7, %v350_v7  ;;  %v383_v30 = vmul.f32 %v351_v14, %v351_v14  ;;  %v354_v33 = vsub.f32 %v2518_v12, %v2597_v15  ;;  %v384_v35 = vmul.f32 %v352_v22, %v352_v22 }
 0x135   :  { %v405_v43 = vadd.f32 %v404_v39, %v374_v37  ;;  %v355_v39 = vsub.f32 %v2527_v18, %v2597_v15  ;;  %v385_v40 = vmul.f32 %v353_v27, %v353_v27 }
 0x136   :  { %v386_v45 = vmul.f32 %v354_v33, %v354_v33 }
 0x137   :  { %v406_v49 = vadd.f32 %v405_v43, %v375_v41  ;;  %v356_v43 = vsub.f32 %v2532_v21, %v2597_v15  ;;  %v387_v54 = vmul.f32 %v355_v39, %v355_v39 }
 0x139   :  { %v407_v57 = vadd.f32 %v406_v49, %v376_v47  ;;  %v357_v49 = vsub.f32 %v2524_v16, %v2597_v15  ;;  %v388_v59 = vmul.f32 %v356_v43, %v356_v43 }
 0x13b   :  { %v408_v63 = vadd.f32 %v407_v57, %v377_v55  ;;  %v358_v57 = vsub.f32 %v2530_v20, %v2597_v15  ;;  %v389_v1 = vmul.f32 %v357_v49, %v357_v49 }
 0x13d   :  { %v409_v6 = vadd.f32 %v408_v63, %v378_v62  ;;  %v359_v63 = vsub.f32 %v2539_v26, %v2597_v15  ;;  %v390_v7 = vmul.f32 %v358_v57, %v358_v57 }
 0x13f   :  { %v410_v11 = vadd.f32 %v409_v6, %v379_v3  ;;  %v360_v6 = vsub.f32 %v2544_v29, %v2597_v15  ;;  %v391_v14 = vmul.f32 %v359_v63, %v359_v63 }
 0x141   :  { %v411_v19 = vadd.f32 %v410_v11, %v380_v9  ;;  %v361_v11 = vsub.f32 %v2536_v24, %v2597_v15  ;;  %v392_v22 = vmul.f32 %v360_v6, %v360_v6 }
 0x143   :  { %v412_v25 = vadd.f32 %v411_v19, %v381_v17  ;;  %v362_v19 = vsub.f32 %v2542_v28, %v2597_v15  ;;  %v393_v27 = vmul.f32 %v361_v11, %v361_v11 }
 0x145   :  { %v413_v31 = vadd.f32 %v412_v25, %v382_v23  ;;  %v363_v25 = vsub.f32 %v2551_v34, %v2597_v15  ;;  %v394_v33 = vmul.f32 %v362_v19, %v362_v19 }
 0x147   :  { %v414_v37 = vadd.f32 %v413_v31, %v383_v30  ;;  %v364_v31 = vsub.f32 %v2559_v38, %v2597_v15  ;;  %v395_v39 = vmul.f32 %v363_v25, %v363_v25 }
 0x149   :  { %v415_v41 = vadd.f32 %v414_v37, %v384_v35  ;;  %v365_v37 = vsub.f32 %v2548_v32, %v2597_v15  ;;  %v396_v43 = vmul.f32 %v364_v31, %v364_v31 }
 0x14b   :  { %v416_v47 = vadd.f32 %v415_v41, %v385_v40  ;;  %v366_v41 = vsub.f32 %v2554_v36, %v2597_v15  ;;  %v397_v49 = vmul.f32 %v365_v37, %v365_v37  ;;  %v449_v37 = vlaneseq }
 0x14d   :  { %v417_v55 = vadd.f32 %v416_v47, %v386_v45  ;;  %v367_v47 = vsub.f32 %v2569_v44, %v2597_v15  ;;  %v398_v57 = vmul.f32 %v366_v41, %v366_v41 }
 0x14f   :  { %v418_v62 = vadd.f32 %v417_v55, %v387_v54  ;;  %v368_v55 = vsub.f32 %v2577_v48, %v2597_v15  ;;  %v399_v63 = vmul.f32 %v367_v47, %v367_v47 }
 0x151   :  { %v419_v3 = vadd.f32 %v418_v62, %v388_v59  ;;  %v369_v62 = vsub.f32 %v2566_v42, %v2597_v15  ;;  %v400_v6 = vmul.f32 %v368_v55, %v368_v55 }
 0x153   :  { %v420_v9 = vadd.f32 %v419_v3, %v389_v1  ;;  %v370_v3 = vsub.f32 %v2572_v46, %v2597_v15 }
 0x155   :  { %v421_v17 = vadd.f32 %v420_v9, %v390_v7  ;;  %v401_v9 = vmul.f32 %v369_v62, %v369_v62 }
 0x157   :  { %v422_v23 = vadd.f32 %v421_v17, %v391_v14  ;;  %v402_v14 = vmul.f32 %v370_v3, %v370_v3 }
 0x159   :  { %v423_v30 = vadd.f32 %v422_v23, %v392_v22 }
 0x15b   :  { %v424_v35 = vadd.f32 %v423_v30, %v393_v27 }
 0x15d   :  { %v425_v40 = vadd.f32 %v424_v35, %v394_v33 }
 0x15f   :  { %v426_v45 = vadd.f32 %v425_v40, %v395_v39  ;;  %v2663_v39 = vshrl.u32 %v449_v37, 7  ;;  %v2668_v40 = vld [vmem:[%s3317_s5] sm:$0xff] }
 0x161   :  { %v427_v54 = vadd.f32 %v426_v45, %v396_v43  ;;  %v451_v41 = vsub.s32 0, %v2663_v39 }
 0x163   :  { %v428_v59 = vadd.f32 %v427_v54, %v397_v49  ;;  %v487_v54 = vsub.s32 1, %v2663_v39 }
 0x165   :  { %v429_v1 = vadd.f32 %v428_v59, %v398_v57 }
 0x167   :  { %v430_v7 = vadd.f32 %v429_v1, %v399_v63 }
 0x169   :  { %v431_v11 = vadd.f32 %v430_v7, %v400_v6 }
 0x16b   :  { %v432_v17 = vadd.f32 %v431_v11, %v401_v9 }
 0x16d   :  { %v433_v19 = vadd.f32 %v432_v17, %v402_v14 }
 0x16f   :  { %v434_v22 = vrot.slane %v433_v19, 4 }
 0x171   :  { %v435_v23 = vadd.f32 %v434_v22, %v433_v19 }
 0x173   :  { %v436_v25 = vrot.slane %v435_v23, 2 }
 0x175   :  { %v437_v27 = vadd.f32 %v436_v25, %v435_v23 }
 0x177   :  { %v438_v30 = vrot.slane %v437_v27, 1 }
 0x179   :  { %v439_v31 = vadd.f32 %v438_v30, %v437_v27 }
 0x17b   :  { %v440_v33 = vmul.f32 0.00390625, %v439_v31 }
 0x17d   :  { %v441_v35 = vadd.f32 1e-05, %v440_v33 }
 0x17f   :  { %2292 = vrsqrt.f32 %v441_v35 }
 0x189   :  { %v2293_v43 = vpop.eup %2292 }
 0x18a   :  { %v443_v45 = vmul.f32 %v2293_v43, %v2668_v40 }
 0x18c   :  { %v444_v47 = vmul.f32 %v443_v45, %v2597_v15  ;;  %v452_v49 = vrot.slane %v443_v45, %v451_v41 }
 0x18e   :  { %v446_v55 = vrot.slane %v444_v47, 7  ;;  %v482_v57 = vmul.f32 %v452_v49, %v2577_v48  ;;  %v2676_v59 = vmul.f32 %v452_v49, %v2479_v51  ;;  %v2679_v62 = vmul.f32 %v452_v49, %v2483_v53 }
 0x18f   :  { %v455_v63 = vmul.f32 %v2477_v50, %v452_v49  ;;  %v456_v1 = vmul.f32 %v2481_v52, %v452_v49  ;;  %v457_v3 = vmul.f32 %v452_v49, %v2491_v58  ;;  %v458_v15 = vmul.f32 %v452_v49, %v2496_v61 }
 0x190   :  { %v448_v6 = vsub.f32 %v2668_v40, %v446_v55  ;;  %v459_v7 = vmul.f32 %v2488_v56, %v452_v49  ;;  %v460_v48 = vmul.f32 %v2494_v60, %v452_v49  ;;  %v461_v51 = vmul.f32 %v452_v49, %v2503_v2 }
 0x191   :  { %v462_v9 = vmul.f32 %v452_v49, %v2508_v5  ;;  %v463_v53 = vmul.f32 %v2500_v0, %v452_v49  ;;  %v464_v50 = vmul.f32 %v2506_v4, %v452_v49  ;;  %v465_v52 = vmul.f32 %v452_v49, %v2515_v10 }
 0x192   :  { %v488_v11 = vrot.slane %v448_v6, %v487_v54  ;;  %v466_v58 = vmul.f32 %v452_v49, %v2520_v13  ;;  %v467_v61 = vmul.f32 %v2512_v8, %v452_v49  ;;  %v468_v14 = vmul.f32 %v2518_v12, %v452_v49 }
 0x193   :  { %v469_v56 = vmul.f32 %v452_v49, %v2527_v18  ;;  %v470_v60 = vmul.f32 %v452_v49, %v2532_v21  ;;  %v471_v2 = vmul.f32 %v2524_v16, %v452_v49  ;;  %v472_v5 = vmul.f32 %v2530_v20, %v452_v49 }
 0x194   :  { %v2700_v0 = vadd.f32 %v488_v11, %v482_v57  ;;  %v473_v4 = vmul.f32 %v452_v49, %v2539_v26  ;;  %v474_v10 = vmul.f32 %v452_v49, %v2544_v29  ;;  %v475_v13 = vmul.f32 %v2536_v24, %v452_v49 }
 0x195   :  { %v476_v8 = vmul.f32 %v2542_v28, %v452_v49  ;;  %v477_v12 = vmul.f32 %v452_v49, %v2551_v34  ;;  %v478_v18 = vmul.f32 %v452_v49, %v2559_v38  ;;  %v479_v21 = vmul.f32 %v2548_v32, %v452_v49 }
 0x196   :  { %v480_v16 = vmul.f32 %v2554_v36, %v452_v49  ;;  %v481_v20 = vmul.f32 %v452_v49, %v2569_v44  ;;  %v483_v17 = vmul.f32 %v2566_v42, %v452_v49  ;;  %v484_v26 = vmul.f32 %v2572_v46, %v452_v49 }
 0x197   :  { %v491_v19 = vadd.f32 %v488_v11, %v455_v63  ;;  %v492_v29 = vadd.f32 %v488_v11, %v456_v1  ;;  %v493_v22 = vadd.f32 %v488_v11, %v457_v3  ;;  %v494_v24 = vadd.f32 %v488_v11, %v458_v15 }
 0x198   :  { %v495_v23 = vadd.f32 %v488_v11, %v459_v7  ;;  %v496_v28 = vadd.f32 %v488_v11, %v460_v48  ;;  %v497_v25 = vadd.f32 %v488_v11, %v461_v51  ;;  %v498_v34 = vadd.f32 %v488_v11, %v462_v9 }
 0x199   :  { %v499_v27 = vadd.f32 %v488_v11, %v463_v53  ;;  %v500_v38 = vadd.f32 %v488_v11, %v464_v50  ;;  %v501_v30 = vadd.f32 %v488_v11, %v465_v52  ;;  %v502_v32 = vadd.f32 %v488_v11, %v466_v58 }
 0x19a   :  { %v503_v31 = vadd.f32 %v488_v11, %v467_v61  ;;  %v504_v36 = vadd.f32 %v488_v11, %v468_v14  ;;  %v505_v33 = vadd.f32 %v488_v11, %v469_v56  ;;  %v506_v44 = vadd.f32 %v488_v11, %v470_v60 }
 0x19b   :  { %v507_v35 = vadd.f32 %v488_v11, %v471_v2  ;;  %v508_v42 = vadd.f32 %v488_v11, %v472_v5  ;;  %v509_v37 = vadd.f32 %v488_v11, %v473_v4  ;;  %v510_v46 = vadd.f32 %v488_v11, %v474_v10 }
 0x19c   :  { %v511_v41 = vadd.f32 %v488_v11, %v475_v13  ;;  %v512_v43 = vadd.f32 %v488_v11, %v476_v8  ;;  %v513_v45 = vadd.f32 %v488_v11, %v477_v12  ;;  %v514_v47 = vadd.f32 %v488_v11, %v478_v18 }
 0x19d   :  { %v515_v49 = vadd.f32 %v488_v11, %v479_v21  ;;  %v516_v54 = vadd.f32 %v488_v11, %v480_v16  ;;  %v517_v55 = vadd.f32 %v488_v11, %v481_v20  ;;  %v519_v57 = vadd.f32 %v488_v11, %v483_v17 }
 0x19e   :  { %v520_v63 = vadd.f32 %v488_v11, %v484_v26  ;;  %v489_v1 = vadd.f32 %v488_v11, %v2676_v59  ;;  %v490_v3 = vadd.f32 %v488_v11, %v2679_v62  ;;  %v523_v15 = vmax.f32 %v491_v19, 0.0 }
 0x19f   :  { %v524_v6 = vmax.f32 %v492_v29, 0.0  ;;  %v525_v7 = vmax.f32 %v493_v22, 0.0  ;;  %v526_v48 = vmax.f32 %v494_v24, 0.0  ;;  %v527_v51 = vmax.f32 %v495_v23, 0.0 }
 0x1a0   :  { %v521_v9 = vmax.f32 %v489_v1, 0.0  ;;  %v522_v53 = vmax.f32 %v490_v3, 0.0  ;;  %v528_v50 = vmax.f32 %v496_v28, 0.0  ;;  %v529_v52 = vmax.f32 %v497_v25, 0.0 }
 0x1a1   :  { %v554_v58 = vpack.c.bf16 %v524_v6, %v523_v15  ;;  %v555_v61 = vpack.c.bf16 %v526_v48, %v525_v7  ;;  %v530_v14 = vmax.f32 %v498_v34, 0.0  ;;  %v531_v56 = vmax.f32 %v499_v27, 0.0 }
 0x1a2   :  { %v553_v60 = vpack.c.bf16 %v522_v53, %v521_v9  ;;  %v556_v2 = vpack.c.bf16 %v528_v50, %v527_v51  ;;  %v532_v5 = vmax.f32 %v500_v38, 0.0  ;;  %v533_v4 = vmax.f32 %v501_v30, 0.0 }
 0x1a3   :  { %v557_v59 = vpack.c.bf16 %v530_v14, %v529_v52  ;;  %v534_v10 = vmax.f32 %v502_v32, 0.0  ;;  %v535_v62 = vmax.f32 %v503_v31, 0.0  ;;  %v536_v11 = vmax.f32 %v504_v36, 0.0 }
 0x1a4   :  { %2119 = vmatprep.mubr.bf16.mxu1 %v553_v60  ;;  %v558_v13 = vpack.c.bf16 %v532_v5, %v531_v56  ;;  %v537_v8 = vmax.f32 %v505_v33, 0.0  ;;  %v538_v12 = vmax.f32 %v506_v44, 0.0  ;;  %v539_v18 = vmax.f32 %v507_v35, 0.0 }
 0x1a5   :  { %2120 = vmatmul.mubr.bf16.vlgmr.msra.gmra.mrb[0].mxu1 %v554_v58  ;;  %v559_v21 = vpack.c.bf16 %v534_v10, %v533_v4  ;;  %v560_v16 = vpack.c.bf16 %v536_v11, %v535_v62  ;;  %v540_v20 = vmax.f32 %v508_v42, 0.0  ;;  %v541_v17 = vmax.f32 %v509_v37, 0.0 }
 0x1a6   :  { %2123 = vmatprep.mubr.bf16.mxu1 %v555_v61  ;;  %v561_v26 = vpack.c.bf16 %v538_v12, %v537_v8  ;;  %v542_v19 = vmax.f32 %v510_v46, 0.0  ;;  %v543_v29 = vmax.f32 %v511_v41, 0.0  ;;  %v544_v22 = vmax.f32 %v512_v43, 0.0 }
 0x1a7   :  { %v562_v24 = vpack.c.bf16 %v540_v20, %v539_v18  ;;  %v545_v23 = vmax.f32 %v513_v45, 0.0  ;;  %v546_v28 = vmax.f32 %v514_v47, 0.0  ;;  %v547_v25 = vmax.f32 %v515_v49, 0.0 }
 0x1a8   :  { %v563_v34 = vpack.c.bf16 %v542_v19, %v541_v17  ;;  %v564_v27 = vpack.c.bf16 %v544_v22, %v543_v29  ;;  %v548_v38 = vmax.f32 %v516_v54, 0.0  ;;  %v549_v30 = vmax.f32 %v517_v55, 0.0 }
 0x1a9   :  { %v565_v32 = vpack.c.bf16 %v546_v28, %v545_v23  ;;  %v550_v31 = vmax.f32 %v2700_v0, 0.0  ;;  %v551_v36 = vmax.f32 %v519_v57, 0.0  ;;  %v552_v33 = vmax.f32 %v520_v63, 0.0 }
 0x1aa   :  { %v566_v44 = vpack.c.bf16 %v548_v38, %v547_v25 }
 0x1ab   :  { %v567_v35 = vpack.c.bf16 %v550_v31, %v549_v30  ;;  %v568_v42 = vpack.c.bf16 %v552_v33, %v551_v36 }
 0x1ad   :  { %2124 = vmatmul.mubr.bf16.gmra.mrb[4].mxu1 %v556_v2 }
 0x1ae   :  { %2127 = vmatprep.mubr.bf16.mxu1 %v557_v59 }
 0x1b5   :  { %2128 = vmatmul.mubr.bf16.gmra.mrb[8].mxu1 %v558_v13 }
 0x1b6   :  { %2131 = vmatprep.mubr.bf16.mxu1 %v559_v21 }
 0x1bd   :  { %2132 = vmatmul.mubr.bf16.gmra.mrb[12].mxu1 %v560_v16 }
 0x1be   :  { %2135 = vmatprep.mubr.bf16.mxu1 %v561_v26 }
 0x1c5   :  { %2136 = vmatmul.mubr.bf16.gmra.mrb[16].mxu1 %v562_v24 }
 0x1c6   :  { %2139 = vmatprep.mubr.bf16.mxu1 %v563_v34  ;;  %v2276_v34 = vld [vmem:[%s3315_s3] sm:$0xff]  }
 0x1c7   :  { %2151 = vmatprep.subr.bf16.mxu0 %v2276_v34 }
 0x1c8   :  { %2152 = vmatpush3.bf16.msra.mxu0 %v2276_v34 }
 0x1cd   :  { %2140 = vmatmul.mubr.bf16.gmra.mrb[20].mxu1 %v564_v27 }
 0x1ce   :  { %2143 = vmatprep.mubr.bf16.mxu1 %v565_v32  ;;  %v2277_v32 = vld [vmem:[%s3315_s3 + $0x8] sm:$0xff]  }
 0x1cf   :  { %2153 = vmatprep.subr.bf16.mxu0 %v2277_v32 }
 0x1d0   :  { %2154 = vmatpush3.bf16.msra.mxu0 %v2277_v32 }
 0x1d5   :  { %2144 = vmatmul.mubr.bf16.gmra.mrb[24].mxu1 %v566_v44 }
 0x1d6   :  { %2147 = vmatprep.mubr.bf16.mxu1 %v567_v35 }
 0x1dd   :  { %2148 = vmatmul.mubr.bf16.gmra.mrb[28].mxu1 %v568_v42  ;;  %v2278_v42 = vld [vmem:[%s3315_s3 + $0x10] sm:$0xff]  }
 0x1de   :  { %2155 = vmatprep.subr.bf16.mxu0 %v2278_v42 }
 0x1df   :  { %2156 = vmatpush3.bf16.msra.mxu0 %v2278_v42 }
 0x278   :  { %v2716_v37 = vpop.f32.mrb[0].mxu1 }
 0x279   :  { %v2718_v0 = vpop.f32.mrb[1].mxu1 }
 0x27a   :  { %v2720_v46 = vpop.f32.mrb[2].mxu1 }
 0x27b   :  { %v2722_v41 = vpop.f32.mrb[3].mxu1 }
 0x27c   :  { %v794_v43 = vadd.f32 %v2722_v41, %v2718_v0 }
 0x27e   :  { %v795_v45 = vadd.f32 %v2716_v37, %v794_v43 }
 0x280   :  { %v2727_v47 = vpop.f32.mrb[4].mxu1  ;;  %v796_v49 = vadd.f32 %v2720_v46, %v795_v45 }
 0x281   :  { %v2730_v54 = vpop.f32.mrb[5].mxu1 }
 0x282   :  { %v797_v55 = vadd.f32 %v796_v49, %v2730_v54  ;;  %v2733_v57 = vpop.f32.mrb[6].mxu1 }
 0x283   :  { %v2735_v63 = vpop.f32.mrb[7].mxu1 }
 0x284   :  { %v798_v1 = vadd.f32 %v797_v55, %v2735_v63  ;;  %v2279_v55 = vld [vmem:[%s3315_s3 + $0x18] sm:$0xff]  }
 0x285   :  { %2157 = vmatprep.subr.bf16.mxu0 %v2279_v55 }
 0x286   :  { %v799_v3 = vadd.f32 %v2727_v47, %v798_v1  ;;  %2158 = vmatpush3.bf16.msra.mxu0 %v2279_v55 }
 0x288   :  { %v2739_v15 = vpop.f32.mrb[8].mxu1  ;;  %v800_v6 = vadd.f32 %v2733_v57, %v799_v3 }
 0x289   :  { %v2742_v7 = vpop.f32.mrb[9].mxu1 }
 0x28a   :  { %v801_v48 = vadd.f32 %v800_v6, %v2742_v7  ;;  %v2745_v51 = vpop.f32.mrb[10].mxu1  ;;  %v2280_v6 = vld [vmem:[%s3315_s3 + $0x20] sm:$0xff]  }
 0x28b   :  { %v2747_v9 = vpop.f32.mrb[11].mxu1  ;;  %2159 = vmatprep.subr.bf16.mxu0 %v2280_v6 }
 0x28c   :  { %v802_v53 = vadd.f32 %v801_v48, %v2747_v9  ;;  %2160 = vmatpush3.bf16.msra.mxu0 %v2280_v6 }
 0x28e   :  { %v803_v50 = vadd.f32 %v2739_v15, %v802_v53 }
 0x290   :  { %v2751_v52 = vpop.f32.mrb[12].mxu1  ;;  %v804_v58 = vadd.f32 %v2745_v51, %v803_v50  ;;  %v2281_v50 = vld [vmem:[%s3315_s3 + $0x28] sm:$0xff]  }
 0x291   :  { %v2754_v61 = vpop.f32.mrb[13].mxu1  ;;  %2161 = vmatprep.subr.bf16.mxu0 %v2281_v50 }
 0x292   :  { %v805_v14 = vadd.f32 %v804_v58, %v2754_v61  ;;  %v2757_v56 = vpop.f32.mrb[14].mxu1  ;;  %2162 = vmatpush3.bf16.msra.mxu0 %v2281_v50 }
 0x293   :  { %v2759_v60 = vpop.f32.mrb[15].mxu1 }
 0x294   :  { %v806_v2 = vadd.f32 %v805_v14, %v2759_v60  ;;  %v2282_v14 = vld [vmem:[%s3315_s3 + $0x30] sm:$0xff]  }
 0x295   :  { %2163 = vmatprep.subr.bf16.mxu0 %v2282_v14 }
 0x296   :  { %v807_v5 = vadd.f32 %v2751_v52, %v806_v2  ;;  %2164 = vmatpush3.bf16.msra.mxu0 %v2282_v14 }
 0x298   :  { %v2763_v4 = vpop.f32.mrb[16].mxu1  ;;  %v808_v59 = vadd.f32 %v2757_v56, %v807_v5  ;;  %v2283_v5 = vld [vmem:[%s3315_s3 + $0x38] sm:$0xff]  }
 0x299   :  { %v2766_v10 = vpop.f32.mrb[17].mxu1  ;;  %2165 = vmatprep.subr.bf16.mxu0 %v2283_v5 }
 0x29a   :  { %v809_v62 = vadd.f32 %v808_v59, %v2766_v10  ;;  %v2769_v11 = vpop.f32.mrb[18].mxu1  ;;  %2166 = vmatpush3.bf16.msra.mxu0 %v2283_v5 }
 0x29b   :  { %v2771_v13 = vpop.f32.mrb[19].mxu1 }
 0x29c   :  { %v810_v8 = vadd.f32 %v809_v62, %v2771_v13 }
 0x29e   :  { %v811_v12 = vadd.f32 %v2763_v4, %v810_v8 }
 0x2a0   :  { %v2775_v18 = vpop.f32.mrb[20].mxu1  ;;  %v812_v21 = vadd.f32 %v2769_v11, %v811_v12 }
 0x2a1   :  { %v2778_v16 = vpop.f32.mrb[21].mxu1 }
 0x2a2   :  { %v813_v20 = vadd.f32 %v812_v21, %v2778_v16  ;;  %v2781_v17 = vpop.f32.mrb[22].mxu1 }
 0x2a3   :  { %v2783_v26 = vpop.f32.mrb[23].mxu1 }
 0x2a4   :  { %v814_v19 = vadd.f32 %v813_v20, %v2783_v26 }
 0x2a6   :  { %v815_v29 = vadd.f32 %v2775_v18, %v814_v19 }
 0x2a8   :  { %v2787_v22 = vpop.f32.mrb[24].mxu1  ;;  %v816_v24 = vadd.f32 %v2781_v17, %v815_v29 }
 0x2a9   :  { %v2790_v23 = vpop.f32.mrb[25].mxu1 }
 0x2aa   :  { %v817_v28 = vadd.f32 %v816_v24, %v2790_v23  ;;  %v2793_v25 = vpop.f32.mrb[26].mxu1 }
 0x2ab   :  { %v2798_v27 = vpop.f32.mrb[27].mxu1 }
 0x2ac   :  { %v818_v38 = vadd.f32 %v817_v28, %v2798_v27 }
 0x2ae   :  { %v819_v30 = vadd.f32 %v2787_v22, %v818_v38 }
 0x2b0   :  { %v2805_v31 = vpop.f32.mrb[28].mxu1  ;;  %v820_v36 = vadd.f32 %v2793_v25, %v819_v30 }
 0x2b1   :  { %v2808_v33 = vpop.f32.mrb[29].mxu1 }
 0x2b2   :  { %v821_v44 = vadd.f32 %v820_v36, %v2808_v33  ;;  %v2811_v35 = vpop.f32.mrb[30].mxu1 }
 0x2b3   :  { %v2816_v43 = vpop.f32.mrb[31].mxu1 }
 0x2b4   :  { %v822_v45 = vadd.f32 %v821_v44, %v2816_v43 }
 0x2b6   :  { %v823_v49 = vadd.f32 %v2805_v31, %v822_v45 }
 0x2b8   :  { %v824_v1 = vadd.f32 %v2811_v35, %v823_v49 }
 0x2ba   :  { %v825_v3 = vrot.slane %v824_v1, 4 }
 0x2bc   :  { %v826_v48 = vadd.f32 %v825_v3, %v824_v1 }
 0x2be   :  { %v827_v53 = vrot.slane %v826_v48, 2 }
 0x2c0   :  { %v828_v58 = vadd.f32 %v827_v53, %v826_v48 }
 0x2c2   :  { %v829_v2 = vrot.slane %v828_v58, 1 }
 0x2c4   :  { %v830_v59 = vadd.f32 %v829_v2, %v828_v58 }
 0x2c6   :  { %v2836_v62 = vmul.f32 0.00390625, %v830_v59 }
 0x2c8   :  { %v832_v8 = vsub.f32 %v2718_v0, %v2836_v62  ;;  %v833_v12 = vsub.f32 %v2722_v41, %v2836_v62  ;;  %v834_v21 = vsub.f32 %v2716_v37, %v2836_v62  ;;  %v835_v29 = vsub.f32 %v2720_v46, %v2836_v62 }
 0x2c9   :  { %v836_v24 = vsub.f32 %v2730_v54, %v2836_v62  ;;  %v837_v38 = vsub.f32 %v2735_v63, %v2836_v62  ;;  %v838_v36 = vsub.f32 %v2727_v47, %v2836_v62  ;;  %v839_v45 = vsub.f32 %v2733_v57, %v2836_v62 }
 0x2ca   :  { %v864_v20 = vmul.f32 %v832_v8, %v832_v8  ;;  %v865_v19 = vmul.f32 %v833_v12, %v833_v12  ;;  %v866_v28 = vmul.f32 %v834_v21, %v834_v21  ;;  %v867_v30 = vmul.f32 %v835_v29, %v835_v29 }
 0x2cb   :  { %v868_v44 = vmul.f32 %v836_v24, %v836_v24  ;;  %v869_v49 = vmul.f32 %v837_v38, %v837_v38  ;;  %v840_v1 = vsub.f32 %v2742_v7, %v2836_v62  ;;  %v870_v3 = vmul.f32 %v838_v36, %v838_v36 }
 0x2cc   :  { %v896_v34 = vadd.f32 %v865_v19, %v864_v20  ;;  %v841_v48 = vsub.f32 %v2747_v9, %v2836_v62  ;;  %v871_v53 = vmul.f32 %v839_v45, %v839_v45  ;;  %v842_v58 = vsub.f32 %v2739_v15, %v2836_v62 }
 0x2cd   :  { %v872_v14 = vmul.f32 %v840_v1, %v840_v1  ;;  %v843_v5 = vsub.f32 %v2745_v51, %v2836_v62  ;;  %v844_v12 = vsub.f32 %v2754_v61, %v2836_v62  ;;  %v845_v19 = vsub.f32 %v2759_v60, %v2836_v62 }
 0x2ce   :  { %v897_v32 = vadd.f32 %v896_v34, %v866_v28  ;;  %v873_v59 = vmul.f32 %v841_v48, %v841_v48  ;;  %v874_v21 = vmul.f32 %v842_v58, %v842_v58  ;;  %v846_v28 = vsub.f32 %v2751_v52, %v2836_v62 }
 0x2cf   :  { %v875_v29 = vmul.f32 %v843_v5, %v843_v5  ;;  %v876_v34 = vmul.f32 %v844_v12, %v844_v12 }
 0x2d0   :  { %v898_v42 = vadd.f32 %v897_v32, %v867_v30  ;;  %v847_v30 = vsub.f32 %v2757_v56, %v2836_v62  ;;  %v877_v32 = vmul.f32 %v845_v19, %v845_v19 }
 0x2d2   :  { %v899_v55 = vadd.f32 %v898_v42, %v868_v44  ;;  %v848_v44 = vsub.f32 %v2766_v10, %v2836_v62  ;;  %v878_v42 = vmul.f32 %v846_v28, %v846_v28 }
 0x2d4   :  { %v900_v6 = vadd.f32 %v899_v55, %v869_v49  ;;  %v849_v49 = vsub.f32 %v2771_v13, %v2836_v62  ;;  %v879_v55 = vmul.f32 %v847_v30, %v847_v30 }
 0x2d6   :  { %v901_v50 = vadd.f32 %v900_v6, %v870_v3  ;;  %v850_v3 = vsub.f32 %v2763_v4, %v2836_v62  ;;  %v880_v6 = vmul.f32 %v848_v44, %v848_v44 }
 0x2d8   :  { %v902_v2 = vadd.f32 %v901_v50, %v871_v53  ;;  %v851_v53 = vsub.f32 %v2769_v11, %v2836_v62  ;;  %v881_v50 = vmul.f32 %v849_v49, %v849_v49 }
 0x2da   :  { %v903_v8 = vadd.f32 %v902_v2, %v872_v14  ;;  %v852_v14 = vsub.f32 %v2778_v16, %v2836_v62  ;;  %v882_v2 = vmul.f32 %v850_v3, %v850_v3  ;;  %v859_v3 = vsub.f32 %v2793_v25, %v2836_v62 }
 0x2dc   :  { %v904_v20 = vadd.f32 %v903_v8, %v873_v59  ;;  %v853_v59 = vsub.f32 %v2783_v26, %v2836_v62  ;;  %v883_v8 = vmul.f32 %v851_v53, %v851_v53  ;;  %v860_v53 = vsub.f32 %v2808_v33, %v2836_v62 }
 0x2de   :  { %v905_v24 = vadd.f32 %v904_v20, %v874_v21  ;;  %v854_v21 = vsub.f32 %v2775_v18, %v2836_v62  ;;  %v884_v20 = vmul.f32 %v852_v14, %v852_v14  ;;  %v2913_v14 = vld [vmem:[%s3316_s4 + $0x10] sm:$0xff]  }
 0x2e0   :  { %v906_v38 = vadd.f32 %v905_v24, %v875_v29  ;;  %v855_v29 = vsub.f32 %v2781_v17, %v2836_v62  ;;  %v885_v24 = vmul.f32 %v853_v59, %v853_v59 }
 0x2e2   :  { %v907_v36 = vadd.f32 %v906_v38, %v876_v34  ;;  %v856_v34 = vsub.f32 %v2790_v23, %v2836_v62  ;;  %v886_v38 = vmul.f32 %v854_v21, %v854_v21 }
 0x2e4   :  { %v908_v45 = vadd.f32 %v907_v36, %v877_v32  ;;  %v857_v32 = vsub.f32 %v2798_v27, %v2836_v62  ;;  %v887_v36 = vmul.f32 %v855_v29, %v855_v29  ;;  %v888_v49 = vmul.f32 %v856_v34, %v856_v34 }
 0x2e6   :  { %v909_v1 = vadd.f32 %v908_v45, %v878_v42  ;;  %v2893_v42 = vld [vmem:[%s3316_s4] sm:$0xff]   ;;  %v858_v45 = vsub.f32 %v2787_v22, %v2836_v62 }
 0x2e7   :  { %2247 = vmatprep.subr.bf16.mxu1 %v2893_v42  ;;  %2199 = vmatprep.subr.bf16.mxu0 %v2893_v42 }
 0x2e8   :  { %v910_v48 = vadd.f32 %v909_v1, %v879_v55  ;;  %v2901_v1 = vld [vmem:[%s3316_s4 + $0x8] sm:$0xff]   ;;  %2255 = vmatpush3.bf16.msra.mxu1 %v2893_v42 }
 0x2e9   :  { %2248 = vmatprep.subr.bf16.mxu1 %v2901_v1 }
 0x2ea   :  { %v911_v58 = vadd.f32 %v910_v48, %v880_v6  ;;  %v889_v6 = vmul.f32 %v857_v32, %v857_v32 }
 0x2ec   :  { %v912_v5 = vadd.f32 %v911_v58, %v881_v50  ;;  %v890_v50 = vmul.f32 %v858_v45, %v858_v45  ;;  %2256 = vmatpush3.bf16.msra.mxu1 %v2901_v1 }
 0x2ed   :  { %2249 = vmatprep.subr.bf16.mxu1 %v2913_v14 }
 0x2ee   :  { %v913_v12 = vadd.f32 %v912_v5, %v882_v2  ;;  %v861_v2 = vsub.f32 %v2816_v43, %v2836_v62  ;;  %v891_v5 = vmul.f32 %v859_v3, %v859_v3 }
 0x2f0   :  { %v914_v19 = vadd.f32 %v913_v12, %v883_v8  ;;  %v862_v8 = vsub.f32 %v2805_v31, %v2836_v62  ;;  %v892_v12 = vmul.f32 %v860_v53, %v860_v53  ;;  %v893_v29 = vmul.f32 %v861_v2, %v861_v2  ;;  %2257 = vmatpush3.bf16.msra.mxu1 %v2913_v14 }
 0x2f2   :  { %v915_v28 = vadd.f32 %v914_v19, %v884_v20  ;;  %v2924_v20 = vld [vmem:[%s3316_s4 + $0x18] sm:$0xff]   ;;  %v863_v19 = vsub.f32 %v2811_v35, %v2836_v62 }
 0x2f3   :  { %2250 = vmatprep.subr.bf16.mxu1 %v2924_v20 }
 0x2f4   :  { %v916_v30 = vadd.f32 %v915_v28, %v885_v24  ;;  %v894_v28 = vmul.f32 %v862_v8, %v862_v8  ;;  %2258 = vmatpush3.bf16.msra.mxu1 %v2924_v20 }
 0x2f6   :  { %v917_v44 = vadd.f32 %v916_v30, %v886_v38  ;;  %v2933_v38 = vld [vmem:[%s3316_s4 + $0x20] sm:$0xff]   ;;  %v895_v30 = vmul.f32 %v863_v19, %v863_v19 }
 0x2f7   :  { %2251 = vmatprep.subr.bf16.mxu1 %v2933_v38 }
 0x2f8   :  { %v918_v55 = vadd.f32 %v917_v44, %v887_v36  ;;  %v2940_v44 = vld [vmem:[%s3316_s4 + $0x28] sm:$0xff]   ;;  %2259 = vmatpush3.bf16.msra.mxu1 %v2933_v38 }
 0x2f9   :  { %2252 = vmatprep.subr.bf16.mxu1 %v2940_v44 }
 0x2fa   :  { %v919_v48 = vadd.f32 %v918_v55, %v888_v49 }
 0x2fc   :  { %v920_v58 = vadd.f32 %v919_v48, %v889_v6  ;;  %2260 = vmatpush3.bf16.msra.mxu1 %v2940_v44 }
 0x2fe   :  { %v921_v59 = vadd.f32 %v920_v58, %v890_v50  ;;  %v944_v58 = vsub.s32 2, %v2663_v39 }
 0x300   :  { %v922_v21 = vadd.f32 %v921_v59, %v891_v5 }
 0x302   :  { %v923_v24 = vadd.f32 %v922_v21, %v892_v12  ;;  %v980_v12 = vsub.s32 3, %v2663_v39 }
 0x304   :  { %v924_v34 = vadd.f32 %v923_v24, %v893_v29 }
 0x306   :  { %v925_v32 = vadd.f32 %v924_v34, %v894_v28 }
 0x308   :  { %v926_v36 = vadd.f32 %v925_v32, %v895_v30 }
 0x30a   :  { %v927_v45 = vrot.slane %v926_v36, 4 }
 0x30c   :  { %v928_v49 = vadd.f32 %v927_v45, %v926_v36 }
 0x30e   :  { %v929_v55 = vrot.slane %v928_v49, 2 }
 0x310   :  { %v930_v3 = vadd.f32 %v929_v55, %v928_v49 }
 0x312   :  { %v931_v6 = vrot.slane %v930_v3, 1 }
 0x314   :  { %v932_v48 = vadd.f32 %v931_v6, %v930_v3 }
 0x316   :  { %v933_v53 = vmul.f32 0.00390625, %v932_v48 }
 0x318   :  { %v934_v50 = vadd.f32 1e-05, %v933_v53 }
 0x31a   :  { %2294 = vrsqrt.f32 %v934_v50 }
 0x324   :  { %v2295_v2 = vpop.eup %2294 }
 0x325   :  { %v936_v5 = vmul.f32 %v2295_v2, %v2668_v40 }
 0x327   :  { %v937_v59 = vmul.f32 %v936_v5, %v2836_v62  ;;  %v945_v8 = vrot.slane %v936_v5, %v944_v58 }
 0x329   :  { %v939_v21 = vrot.slane %v937_v59, 7  ;;  %v975_v19 = vmul.f32 %v945_v8, %v2816_v43  ;;  %v946_v29 = vmul.f32 %v945_v8, %v2718_v0  ;;  %v947_v24 = vmul.f32 %v945_v8, %v2722_v41 }
 0x32a   :  { %v948_v28 = vmul.f32 %v2716_v37, %v945_v8  ;;  %v949_v34 = vmul.f32 %v2720_v46, %v945_v8  ;;  %v950_v30 = vmul.f32 %v945_v8, %v2730_v54  ;;  %v951_v32 = vmul.f32 %v945_v8, %v2735_v63 }
 0x32b   :  { %v941_v62 = vsub.f32 %v2668_v40, %v939_v21  ;;  %v952_v36 = vmul.f32 %v2727_v47, %v945_v8  ;;  %v953_v45 = vmul.f32 %v2733_v57, %v945_v8  ;;  %v954_v43 = vmul.f32 %v945_v8, %v2742_v7 }
 0x32c   :  { %v955_v0 = vmul.f32 %v945_v8, %v2747_v9  ;;  %v956_v41 = vmul.f32 %v2739_v15, %v945_v8  ;;  %v957_v37 = vmul.f32 %v2745_v51, %v945_v8  ;;  %v958_v46 = vmul.f32 %v945_v8, %v2754_v61 }
 0x32d   :  { %v981_v49 = vrot.slane %v941_v62, %v980_v12  ;;  %v959_v54 = vmul.f32 %v945_v8, %v2759_v60  ;;  %v960_v63 = vmul.f32 %v2751_v52, %v945_v8  ;;  %v961_v40 = vmul.f32 %v2757_v56, %v945_v8 }
 0x32e   :  { %v962_v47 = vmul.f32 %v945_v8, %v2766_v10  ;;  %v963_v57 = vmul.f32 %v945_v8, %v2771_v13  ;;  %v964_v7 = vmul.f32 %v2763_v4, %v945_v8  ;;  %v965_v9 = vmul.f32 %v2769_v11, %v945_v8 }
 0x32f   :  { %v2971_v15 = vadd.f32 %v981_v49, %v975_v19  ;;  %v966_v51 = vmul.f32 %v945_v8, %v2778_v16  ;;  %v967_v61 = vmul.f32 %v945_v8, %v2783_v26  ;;  %v968_v60 = vmul.f32 %v2775_v18, %v945_v8 }
 0x330   :  { %v969_v52 = vmul.f32 %v2781_v17, %v945_v8  ;;  %v970_v56 = vmul.f32 %v945_v8, %v2790_v23  ;;  %v971_v10 = vmul.f32 %v945_v8, %v2798_v27  ;;  %v972_v13 = vmul.f32 %v2787_v22, %v945_v8 }
 0x331   :  { %v973_v4 = vmul.f32 %v2793_v25, %v945_v8  ;;  %v974_v11 = vmul.f32 %v945_v8, %v2808_v33  ;;  %v976_v55 = vmul.f32 %v2805_v31, %v945_v8  ;;  %v977_v16 = vmul.f32 %v2811_v35, %v945_v8 }
 0x332   :  { %v2984_v3 = vadd.f32 %v981_v49, %v946_v29  ;;  %v2986_v26 = vadd.f32 %v981_v49, %v947_v24  ;;  %v2988_v18 = vadd.f32 %v981_v49, %v948_v28  ;;  %v2990_v17 = vadd.f32 %v981_v49, %v949_v34 }
 0x333   :  { %v2992_v23 = vadd.f32 %v981_v49, %v950_v30  ;;  %v2994_v27 = vadd.f32 %v981_v49, %v951_v32  ;;  %v2996_v22 = vadd.f32 %v981_v49, %v952_v36  ;;  %v2998_v25 = vadd.f32 %v981_v49, %v953_v45 }
 0x334   :  { %v3000_v33 = vadd.f32 %v981_v49, %v954_v43  ;;  %v3002_v31 = vadd.f32 %v981_v49, %v955_v0  ;;  %v3004_v35 = vadd.f32 %v981_v49, %v956_v41  ;;  %v3006_v6 = vadd.f32 %v981_v49, %v957_v37 }
 0x335   :  { %v3008_v48 = vadd.f32 %v981_v49, %v958_v46  ;;  %v3010_v53 = vadd.f32 %v981_v49, %v959_v54  ;;  %v3012_v50 = vadd.f32 %v981_v49, %v960_v63  ;;  %v3014_v58 = vadd.f32 %v981_v49, %v961_v40 }
 0x336   :  { %v3016_v2 = vadd.f32 %v981_v49, %v962_v47  ;;  %v3018_v5 = vadd.f32 %v981_v49, %v963_v57  ;;  %v3020_v59 = vadd.f32 %v981_v49, %v964_v7  ;;  %v3022_v8 = vadd.f32 %v981_v49, %v965_v9 }
 0x337   :  { %v3024_v12 = vadd.f32 %v981_v49, %v966_v51  ;;  %v3026_v21 = vadd.f32 %v981_v49, %v967_v61  ;;  %v3028_v19 = vadd.f32 %v981_v49, %v968_v60  ;;  %v3030_v29 = vadd.f32 %v981_v49, %v969_v52 }
 0x338   :  { %v3032_v24 = vadd.f32 %v981_v49, %v970_v56  ;;  %v3034_v28 = vadd.f32 %v981_v49, %v971_v10  ;;  %v3036_v34 = vadd.f32 %v981_v49, %v972_v13  ;;  %v3038_v30 = vadd.f32 %v981_v49, %v973_v4 }
 0x339   :  { %v3040_v32 = vadd.f32 %v981_v49, %v974_v11  ;;  %v3042_v62 = vadd.f32 %v981_v49, %v976_v55  ;;  %v3044_v36 = vadd.f32 %v981_v49, %v977_v16  ;;  %v1016_v45 = vmax.f32 %v2988_v18, 0.0 }
 0x33a   :  { %v1017_v43 = vmax.f32 %v2990_v17, 0.0  ;;  %v1014_v0 = vmax.f32 %v2984_v3, 0.0  ;;  %v1015_v41 = vmax.f32 %v2986_v26, 0.0  ;;  %v1018_v37 = vmax.f32 %v2992_v23, 0.0 }
 0x33b   :  { %v1019_v46 = vmax.f32 %v2994_v27, 0.0  ;;  %v1020_v40 = vmax.f32 %v2996_v22, 0.0  ;;  %v1021_v47 = vmax.f32 %v2998_v25, 0.0  ;;  %v3340_v57 = vmax.f32 %v3000_v33, 0.0 }
 0x33c   :  { %v1047_v54 = vpack.c.bf16 %v1017_v43, %v1016_v45  ;;  %v1046_v49 = vpack.c.bf16 %v1015_v41, %v1014_v0  ;;  %v3339_v7 = vmax.f32 %v3002_v31, 0.0  ;;  %v1024_v51 = vmax.f32 %v3004_v35, 0.0 }
 0x33d   :  { %v1048_v63 = vpack.c.bf16 %v1019_v46, %v1018_v37  ;;  %v1049_v9 = vpack.c.bf16 %v1021_v47, %v1020_v40  ;;  %v3336_v61 = vmax.f32 %v3008_v48, 0.0  ;;  %v3335_v60 = vmax.f32 %v3010_v53, 0.0 }
 0x33e   :  { %2167 = vmatprep.mubr.bf16.mxu0 %v1046_v49  ;;  %v3338_v56 = vmax.f32 %v3012_v50, 0.0  ;;  %v3332_v10 = vmax.f32 %v3016_v2, 0.0  ;;  %v3331_v13 = vmax.f32 %v3018_v5, 0.0  ;;  %v3334_v11 = vmax.f32 %v3020_v59, 0.0 }
 0x33f   :  { %2168 = vmatmul.mubr.bf16.vlgmr.msra.gmra.mrb[32].mxu0 %v1047_v54  ;;  %v3333_v55 = vmax.f32 %v3022_v8, 0.0  ;;  %v3320_v16 = vmax.f32 %v3024_v12, 0.0 }
 0x340   :  { %2171 = vmatprep.mubr.bf16.mxu0 %v1048_v63  ;;  %2200 = vmatpush3.bf16.msra.mxu0 %v2893_v42  ;;  %v1050_v42 = vpack.c.bf16 %v3339_v7, %v3340_v57  ;;  %v3330_v63 = vmax.f32 %v3028_v19, 0.0 }
 0x341   :  { %2201 = vmatprep.subr.bf16.mxu0 %v2901_v1  ;;  %v1055_v54 = vpack.c.bf16 %v3333_v55, %v3334_v11 }
 0x344   :  { %2202 = vmatpush3.bf16.msra.mxu0 %v2901_v1  ;;  %v1025_v1 = vmax.f32 %v3006_v6, 0.0 }
 0x345   :  { %2203 = vmatprep.subr.bf16.mxu0 %v2913_v14 }
 0x346   :  { %v1051_v52 = vpack.c.bf16 %v1025_v1, %v1024_v51 }
 0x347   :  { %2172 = vmatmul.mubr.bf16.gmra.mrb[36].mxu0 %v1049_v9  ;;  %v3329_v9 = vmax.f32 %v3030_v29, 0.0 }
 0x348   :  { %2175 = vmatprep.mubr.bf16.mxu0 %v1050_v42  ;;  %2204 = vmatpush3.bf16.msra.mxu0 %v2913_v14  ;;  %v1052_v14 = vpack.c.bf16 %v3335_v60, %v3336_v61  ;;  %v3322_v42 = vmax.f32 %v3032_v24, 0.0 }
 0x349   :  { %2205 = vmatprep.subr.bf16.mxu0 %v2924_v20 }
 0x34c   :  { %2206 = vmatpush3.bf16.msra.mxu0 %v2924_v20  ;;  %v3337_v20 = vmax.f32 %v3014_v58, 0.0 }
 0x34d   :  { %2207 = vmatprep.subr.bf16.mxu0 %v2933_v38 }
 0x34e   :  { %v1053_v4 = vpack.c.bf16 %v3337_v20, %v3338_v56 }
 0x34f   :  { %2176 = vmatmul.mubr.bf16.gmra.mrb[40].mxu0 %v1051_v52  ;;  %v3321_v52 = vmax.f32 %v3034_v28, 0.0 }
 0x350   :  { %2179 = vmatprep.mubr.bf16.mxu0 %v1052_v14  ;;  %2208 = vmatpush3.bf16.msra.mxu0 %v2933_v38  ;;  %v1054_v38 = vpack.c.bf16 %v3331_v13, %v3332_v10  ;;  %v1057_v14 = vpack.c.bf16 %v3329_v9, %v3330_v63 }
 0x351   :  { %2209 = vmatprep.subr.bf16.mxu0 %v2940_v44 }
 0x354   :  { %2210 = vmatpush3.bf16.msra.mxu0 %v2940_v44  ;;  %v3319_v44 = vmax.f32 %v3026_v21, 0.0 }
 0x356   :  { %v1056_v49 = vpack.c.bf16 %v3319_v44, %v3320_v16  ;;  %v3324_v44 = vmax.f32 %v2971_v15, 0.0 }
 0x357   :  { %2180 = vmatmul.mubr.bf16.gmra.mrb[44].mxu0 %v1053_v4  ;;  %v1058_v4 = vpack.c.bf16 %v3321_v52, %v3322_v42 }
 0x358   :  { %2183 = vmatprep.mubr.bf16.mxu0 %v1054_v38  ;;  %v3328_v38 = vmax.f32 %v3036_v34, 0.0 }
 0x35f   :  { %2184 = vmatmul.mubr.bf16.gmra.mrb[48].mxu0 %v1055_v54  ;;  %v3323_v54 = vmax.f32 %v3038_v30, 0.0 }
 0x360   :  { %2187 = vmatprep.mubr.bf16.mxu0 %v1056_v49  ;;  %v3325_v49 = vmax.f32 %v3040_v32, 0.0 }
 0x361   :  { %v1059_v16 = vpack.c.bf16 %v3323_v54, %v3328_v38  ;;  %v2290_v54 = vld [vmem:[%s3316_s4 + $0x30] sm:$0xff]  }
 0x362   :  { %v1060_v52 = vpack.c.bf16 %v3324_v44, %v3325_v49  ;;  %v2291_v44 = vld [vmem:[%s3316_s4 + $0x38] sm:$0xff]   ;;  %2253 = vmatprep.subr.bf16.mxu1 %v2290_v54  ;;  %2211 = vmatprep.subr.bf16.mxu0 %v2290_v54  ;;  %s2321_s4 = smov [#allocation2]  }
 0x363   :  { %2261 = vmatpush3.bf16.msra.mxu1 %v2290_v54  ;;  %2212 = vmatpush3.bf16.msra.mxu0 %v2290_v54 }
 0x364   :  { %2213 = vmatprep.subr.bf16.mxu0 %v2291_v44  ;;  %2254 = vmatprep.subr.bf16.mxu1 %v2291_v44 }
 0x367   :  { %2188 = vmatmul.mubr.bf16.gmra.mrb[52].mxu0 %v1057_v14  ;;  %v3327_v14 = vmax.f32 %v3042_v62, 0.0  ;;  %2262 = vmatpush3.bf16.msra.mxu1 %v2291_v44 }
 0x368   :  { %2191 = vmatprep.mubr.bf16.mxu0 %v1058_v4  ;;  %v3326_v4 = vmax.f32 %v3044_v36, 0.0  ;;  %2214 = vmatpush3.bf16.msra.mxu0 %v2291_v44 }
 0x36a   :  { %v1061_v42 = vpack.c.bf16 %v3326_v4, %v3327_v14 }
 0x36f   :  { %2192 = vmatmul.mubr.bf16.gmra.mrb[56].mxu0 %v1059_v16  ;;  %v1080_v16 = vsub.s32 4, %v2663_v39 }
 0x370   :  { %2195 = vmatprep.mubr.bf16.mxu0 %v1060_v52 }
 0x377   :  { %2196 = vmatmul.mubr.bf16.gmra.mrb[60].mxu0 %v1061_v42  ;;  %v3163_v42 = vld [vmem:[%s3317_s5] sm:$0xff]  ;;  %s1765_s5 = sshll.u32 %s2321_s4, 4  ;;  %s1766_s5 = int_to_ptr.vmem [resolvable:$true] %s1765_s5 }
 0x378   :  { %v3166_v52 = vrot.slane %v3163_v42, %v1080_v16  ;;  %s2297_s11 = scalar_lea.vmem %s1766_s5, 2048  ;;  %p2302_p1 = scmp.lt.s32.totalorder %s1766_s5, %s1766_s5 }
 0x379   :  { %p2298_p0 = scmp.ne.s32.totalorder %s1766_s5, %s2297_s11  ;;  %p2303_p2 = scmp.lt.s32.totalorder %s2297_s11, %s2297_s11 }
 0x37b   :  { %p2304_p3 = por %p2303_p2, %p2302_p1 }
 0x37d   :  { %p2305_p4 = pnand %p2304_p3, %p2298_p0 }
 0x412   :  { %v2169_v49 = vpop.f32.mrb[32].mxu0 }
 0x413   :  { %v1173_v4 = vadd.f32 %v2169_v49, %v3166_v52  ;;  %v1164_v14 = vpop.f32.mrb[33].mxu0 }
 0x414   :  { %v1165_v54 = vadd.f32 %v1164_v14, %v3166_v52  ;;  %v2170_v38 = vpop.f32.mrb[34].mxu0 }
 0x415   :  { %v1176_v9 = vadd.f32 %v2170_v38, %v3166_v52  ;;  %v1167_v44 = vpop.f32.mrb[35].mxu0  ;;  %v1293_v13 = vmax.f32 %v1173_v4, 0.0 }
 0x416   :  { %v1168_v63 = vadd.f32 %v1167_v44, %v3166_v52  ;;  %v1291_v55 = vmax.f32 %v1165_v54, 0.0 }
 0x417   :  { %v1294_v10 = vmax.f32 %v1176_v9, 0.0 }
 0x418   :  { %v1292_v11 = vmax.f32 %v1168_v63, 0.0 }
 0x419   :  { %v1324_v60 = vpack.c.bf16 %v1294_v10, %v1293_v13 }
 0x41a   :  { %v1323_v61 = vpack.c.bf16 %v1292_v11, %v1291_v55  ;;  %v2173_v16 = vpop.f32.mrb[36].mxu0 }
 0x41b   :  { %v1189_v20 = vadd.f32 %v2173_v16, %v3166_v52  ;;  %v1180_v56 = vpop.f32.mrb[37].mxu0 }
 0x41c   :  { %v1181_v49 = vadd.f32 %v1180_v56, %v3166_v52  ;;  %v2174_v7 = vpop.f32.mrb[38].mxu0  ;;  %2215 = vmatprep.mubr.bf16.mxu0 %v1323_v61 }
 0x41d   :  { %v1192_v14 = vadd.f32 %v2174_v7, %v3166_v52  ;;  %v1183_v38 = vpop.f32.mrb[39].mxu0  ;;  %2216 = vmatmul.mubr.bf16.vlgmr.msra.gmra.mrb[64].mxu0 %v1324_v60  ;;  %v1297_v4 = vmax.f32 %v1189_v20, 0.0 }
 0x41e   :  { %v1184_v44 = vadd.f32 %v1183_v38, %v3166_v52  ;;  %v1295_v54 = vmax.f32 %v1181_v49, 0.0 }
 0x41f   :  { %v1298_v9 = vmax.f32 %v1192_v14, 0.0 }
 0x420   :  { %v1296_v63 = vmax.f32 %v1184_v44, 0.0 }
 0x421   :  { %v1326_v10 = vpack.c.bf16 %v1298_v9, %v1297_v4 }
 0x422   :  { %v1325_v13 = vpack.c.bf16 %v1296_v63, %v1295_v54  ;;  %v2177_v11 = vpop.f32.mrb[40].mxu0 }
 0x423   :  { %v1205_v55 = vadd.f32 %v2177_v11, %v3166_v52  ;;  %v1196_v16 = vpop.f32.mrb[41].mxu0 }
 0x424   :  { %v1197_v56 = vadd.f32 %v1196_v16, %v3166_v52  ;;  %v2178_v57 = vpop.f32.mrb[42].mxu0  ;;  %2219 = vmatprep.mubr.bf16.mxu1 %v1325_v13 }
 0x425   :  { %v1208_v7 = vadd.f32 %v2178_v57, %v3166_v52  ;;  %v1199_v61 = vpop.f32.mrb[43].mxu0  ;;  %2220 = vmatmul.mubr.bf16.vlgmr.msra.gmra.mrb[32].mxu1 %v1326_v10  ;;  %v1301_v20 = vmax.f32 %v1205_v55, 0.0 }
 0x426   :  { %v1200_v60 = vadd.f32 %v1199_v61, %v3166_v52  ;;  %v1299_v49 = vmax.f32 %v1197_v56, 0.0 }
 0x427   :  { %v1302_v14 = vmax.f32 %v1208_v7, 0.0 }
 0x428   :  { %v1300_v38 = vmax.f32 %v1200_v60, 0.0 }
 0x429   :  { %v1328_v44 = vpack.c.bf16 %v1302_v14, %v1301_v20 }
 0x42a   :  { %v1327_v4 = vpack.c.bf16 %v1300_v38, %v1299_v49  ;;  %v2181_v9 = vpop.f32.mrb[44].mxu0 }
 0x42b   :  { %v1221_v54 = vadd.f32 %v2181_v9, %v3166_v52  ;;  %v1212_v63 = vpop.f32.mrb[45].mxu0 }
 0x42c   :  { %v1213_v11 = vadd.f32 %v1212_v63, %v3166_v52  ;;  %v2182_v16 = vpop.f32.mrb[46].mxu0  ;;  %2223 = vmatprep.mubr.bf16.mxu1 %v1327_v4 }
 0x42d   :  { %v1224_v57 = vadd.f32 %v2182_v16, %v3166_v52  ;;  %v1215_v13 = vpop.f32.mrb[47].mxu0  ;;  %2224 = vmatmul.mubr.bf16.gmra.mrb[36].mxu1 %v1328_v44  ;;  %v1305_v55 = vmax.f32 %v1221_v54, 0.0 }
 0x42e   :  { %v1216_v10 = vadd.f32 %v1215_v13, %v3166_v52  ;;  %v1303_v56 = vmax.f32 %v1213_v11, 0.0 }
 0x42f   :  { %v1306_v7 = vmax.f32 %v1224_v57, 0.0 }
 0x430   :  { %v1304_v61 = vmax.f32 %v1216_v10, 0.0 }
 0x431   :  { %v1330_v60 = vpack.c.bf16 %v1306_v7, %v1305_v55 }
 0x432   :  { %v1329_v20 = vpack.c.bf16 %v1304_v61, %v1303_v56  ;;  %v2185_v14 = vpop.f32.mrb[48].mxu0 }
 0x433   :  { %v1237_v49 = vadd.f32 %v2185_v14, %v3166_v52  ;;  %v1228_v38 = vpop.f32.mrb[49].mxu0 }
 0x434   :  { %v1229_v9 = vadd.f32 %v1228_v38, %v3166_v52  ;;  %v2186_v63 = vpop.f32.mrb[50].mxu0  ;;  %2227 = vmatprep.mubr.bf16.mxu1 %v1329_v20 }
 0x435   :  { %v1240_v4 = vadd.f32 %v2186_v63, %v3166_v52  ;;  %v1231_v16 = vpop.f32.mrb[51].mxu0  ;;  %2228 = vmatmul.mubr.bf16.gmra.mrb[40].mxu1 %v1330_v60  ;;  %v1309_v54 = vmax.f32 %v1237_v49, 0.0 }
 0x436   :  { %v1232_v44 = vadd.f32 %v1231_v16, %v3166_v52  ;;  %v1307_v11 = vmax.f32 %v1229_v9, 0.0 }
 0x437   :  { %v1310_v57 = vmax.f32 %v1240_v4, 0.0 }
 0x438   :  { %v1308_v13 = vmax.f32 %v1232_v44, 0.0 }
 0x439   :  { %v1332_v10 = vpack.c.bf16 %v1310_v57, %v1309_v54 }
 0x43a   :  { %v1331_v55 = vpack.c.bf16 %v1308_v13, %v1307_v11  ;;  %v2189_v7 = vpop.f32.mrb[52].mxu0 }
 0x43b   :  { %v1253_v56 = vadd.f32 %v2189_v7, %v3166_v52  ;;  %v1244_v61 = vpop.f32.mrb[53].mxu0 }
 0x43c   :  { %v1245_v14 = vadd.f32 %v1244_v61, %v3166_v52  ;;  %v2190_v38 = vpop.f32.mrb[54].mxu0  ;;  %2231 = vmatprep.mubr.bf16.mxu1 %v1331_v55 }
 0x43d   :  { %v1256_v20 = vadd.f32 %v2190_v38, %v3166_v52  ;;  %v1247_v63 = vpop.f32.mrb[55].mxu0  ;;  %2232 = vmatmul.mubr.bf16.gmra.mrb[44].mxu1 %v1332_v10  ;;  %v1313_v49 = vmax.f32 %v1253_v56, 0.0 }
 0x43e   :  { %v1248_v60 = vadd.f32 %v1247_v63, %v3166_v52  ;;  %v1311_v9 = vmax.f32 %v1245_v14, 0.0 }
 0x43f   :  { %v1314_v4 = vmax.f32 %v1256_v20, 0.0 }
 0x440   :  { %v1312_v16 = vmax.f32 %v1248_v60, 0.0 }
 0x441   :  { %v1334_v44 = vpack.c.bf16 %v1314_v4, %v1313_v49 }
 0x442   :  { %v1333_v54 = vpack.c.bf16 %v1312_v16, %v1311_v9  ;;  %v2193_v57 = vpop.f32.mrb[56].mxu0 }
 0x443   :  { %v1269_v11 = vadd.f32 %v2193_v57, %v3166_v52  ;;  %v1260_v13 = vpop.f32.mrb[57].mxu0 }
 0x444   :  { %v1261_v7 = vadd.f32 %v1260_v13, %v3166_v52  ;;  %v2194_v61 = vpop.f32.mrb[58].mxu0  ;;  %2235 = vmatprep.mubr.bf16.mxu1 %v1333_v54 }
 0x445   :  { %v1272_v55 = vadd.f32 %v2194_v61, %v3166_v52  ;;  %v1263_v38 = vpop.f32.mrb[59].mxu0  ;;  %2236 = vmatmul.mubr.bf16.gmra.mrb[48].mxu1 %v1334_v44  ;;  %v1317_v56 = vmax.f32 %v1269_v11, 0.0 }
 0x446   :  { %v1264_v10 = vadd.f32 %v1263_v38, %v3166_v52  ;;  %v1315_v14 = vmax.f32 %v1261_v7, 0.0 }
 0x447   :  { %v1318_v20 = vmax.f32 %v1272_v55, 0.0 }
 0x448   :  { %v1316_v63 = vmax.f32 %v1264_v10, 0.0 }
 0x449   :  { %v1336_v60 = vpack.c.bf16 %v1318_v20, %v1317_v56  ;;  %v1357_v20 = vsub.s32 5, %v2663_v39 }
 0x44a   :  { %v1335_v49 = vpack.c.bf16 %v1316_v63, %v1315_v14  ;;  %v2197_v4 = vpop.f32.mrb[60].mxu0 }
 0x44b   :  { %v1285_v9 = vadd.f32 %v2197_v4, %v3166_v52  ;;  %v1276_v16 = vpop.f32.mrb[61].mxu0  ;;  %v3202_v14 = vrot.slane %v3163_v42, %v1357_v20 }
 0x44c   :  { %v1277_v57 = vadd.f32 %v1276_v16, %v3166_v52  ;;  %v2198_v13 = vpop.f32.mrb[62].mxu0  ;;  %2239 = vmatprep.mubr.bf16.mxu1 %v1335_v49 }
 0x44d   :  { %v1288_v54 = vadd.f32 %v2198_v13, %v3166_v52  ;;  %v1279_v61 = vpop.f32.mrb[63].mxu0  ;;  %2240 = vmatmul.mubr.bf16.gmra.mrb[52].mxu1 %v1336_v60  ;;  %v1321_v11 = vmax.f32 %v1285_v9, 0.0 }
 0x44e   :  { %v1280_v44 = vadd.f32 %v1279_v61, %v3166_v52  ;;  %v1319_v7 = vmax.f32 %v1277_v57, 0.0 }
 0x44f   :  { %v1322_v55 = vmax.f32 %v1288_v54, 0.0 }
 0x450   :  { %v1320_v38 = vmax.f32 %v1280_v44, 0.0 }
 0x451   :  { %v1338_v10 = vpack.c.bf16 %v1322_v55, %v1321_v11 }
 0x452   :  { %v1337_v56 = vpack.c.bf16 %v1320_v38, %v1319_v7 }
 0x454   :  { %2243 = vmatprep.mubr.bf16.mxu1 %v1337_v56 }
 0x455   :  { %2244 = vmatmul.mubr.bf16.gmra.mrb[56].mxu1 %v1338_v10 }
 0x4f0   :  { %v2217_v63 = vpop.f32.mrb[64].mxu0 }
 0x4f1   :  { %v1450_v49 = vadd.f32 %v2217_v63, %v3202_v14  ;;  %v1441_v4 = vpop.f32.mrb[65].mxu0 }
 0x4f2   :  { %v1442_v60 = vadd.f32 %v1441_v4, %v3202_v14  ;;  %v2218_v52 = vpop.f32.mrb[66].mxu0 }
 0x4f3   :  { %v1453_v9 = vadd.f32 %v2218_v52, %v3202_v14  ;;  %v1444_v16 = vpop.f32.mrb[67].mxu0  ;;  %v1570_v13 = vadd.f32 %v1450_v49, %v1016_v45 }
 0x4f4   :  { %v1445_v57 = vadd.f32 %v1444_v16, %v3202_v14  ;;  %v1568_v42 = vadd.f32 %v1442_v60, %v1014_v0  ;;  %v3342_v60 = vmax.f32 %v3002_v31, 0.0 }
 0x4f5   :  { %v1571_v39 = vadd.f32 %v1453_v9, %v1017_v43 }
 0x4f6   :  { %v1569_v54 = vadd.f32 %v1445_v57, %v1015_v41 }
 0x4f7   :  { %v1890_v61 = vpack.c.bf16 %v1571_v39, %v1570_v13 }
 0x4f8   :  { %v1885_v44 = vpack.c.bf16 %v1569_v54, %v1568_v42  ;;  %v2221_v11 = vpop.f32.mrb[32].mxu1  ;;  %v3343_v42 = vmax.f32 %v3012_v50, 0.0  ;;  %v3344_v54 = vmax.f32 %v3014_v58, 0.0 }
 0x4f9   :  { %1962 = vst [vmem:[#allocation2 + $0x8] sm:$0xff] %v1890_v61   ;;  %v1466_v55 = vadd.f32 %v2221_v11, %v3202_v14  ;;  %v1457_v7 = vpop.f32.mrb[33].mxu1 }
 0x4fa   :  { %1886 = vst [vmem:[#allocation2] sm:$0xff] %v1885_v44   ;;  %v1458_v18 = vadd.f32 %v1457_v7, %v3202_v14  ;;  %v2222_v45 = vpop.f32.mrb[34].mxu1  ;;  %v3345_v44 = vmax.f32 %v3008_v48, 0.0 }
 0x4fb   :  { %v1469_v17 = vadd.f32 %v2222_v45, %v3202_v14  ;;  %v1460_v43 = vpop.f32.mrb[35].mxu1  ;;  %v1574_v26 = vadd.f32 %v1466_v55, %v1020_v40  ;;  %v3346_v55 = vmax.f32 %v3010_v53, 0.0 }
 0x4fc   :  { %v1461_v3 = vadd.f32 %v1460_v43, %v3202_v14  ;;  %v1572_v41 = vadd.f32 %v1458_v18, %v1018_v37 }
 0x4fd   :  { %v1575_v0 = vadd.f32 %v1469_v17, %v1021_v47 }
 0x4fe   :  { %v1573_v38 = vadd.f32 %v1461_v3, %v1019_v46  ;;  %v3341_v46 = vmax.f32 %v3000_v33, 0.0 }
 0x4ff   :  { %v1900_v10 = vpack.c.bf16 %v1575_v0, %v1574_v26 }
 0x500   :  { %v1895_v56 = vpack.c.bf16 %v1573_v38, %v1572_v41  ;;  %v2225_v20 = vpop.f32.mrb[36].mxu1  ;;  %v3347_v41 = vmax.f32 %v3020_v59, 0.0  ;;  %v3348_v38 = vmax.f32 %v3022_v8, 0.0 }
 0x501   :  { %1964 = vst [vmem:[#allocation2 + $0x18] sm:$0xff] %v1900_v10   ;;  %v1482_v63 = vadd.f32 %v2225_v20, %v3202_v14  ;;  %v1473_v49 = vpop.f32.mrb[37].mxu1 }
 0x502   :  { %1963 = vst [vmem:[#allocation2 + $0x10] sm:$0xff] %v1895_v56   ;;  %v1474_v22 = vadd.f32 %v1473_v49, %v3202_v14  ;;  %v2226_v40 = vpop.f32.mrb[38].mxu1  ;;  %v3349_v56 = vmax.f32 %v3016_v2, 0.0 }
 0x503   :  { %v1485_v25 = vadd.f32 %v2226_v40, %v3202_v14  ;;  %v1476_v47 = vpop.f32.mrb[39].mxu1  ;;  %v1578_v27 = vadd.f32 %v1482_v63, %v1024_v51  ;;  %v3350_v63 = vmax.f32 %v3018_v5, 0.0 }
 0x504   :  { %v1477_v23 = vadd.f32 %v1476_v47, %v3202_v14  ;;  %v1576_v4 = vadd.f32 %v1474_v22, %v3341_v46  ;;  %v3351_v46 = vmax.f32 %v3028_v19, 0.0 }
 0x505   :  { %v1579_v37 = vadd.f32 %v1485_v25, %v1025_v1 }
 0x506   :  { %v1577_v52 = vadd.f32 %v1477_v23, %v3342_v60 }
 0x507   :  { %v1910_v9 = vpack.c.bf16 %v1579_v37, %v1578_v27 }
 0x508   :  { %v1905_v16 = vpack.c.bf16 %v1577_v52, %v1576_v4  ;;  %v2229_v57 = vpop.f32.mrb[40].mxu1  ;;  %v3352_v4 = vmax.f32 %v3030_v29, 0.0  ;;  %v3353_v52 = vmax.f32 %v3024_v12, 0.0 }
 0x509   :  { %1966 = vst [vmem:[#allocation2 + $0x28] sm:$0xff] %v1910_v9   ;;  %v1498_v13 = vadd.f32 %v2229_v57, %v3202_v14  ;;  %v1489_v39 = vpop.f32.mrb[41].mxu1 }
 0x50a   :  { %1965 = vst [vmem:[#allocation2 + $0x20] sm:$0xff] %v1905_v16   ;;  %v1490_v35 = vadd.f32 %v1489_v39, %v3202_v14  ;;  %v2230_v51 = vpop.f32.mrb[42].mxu1  ;;  %v3354_v16 = vmax.f32 %v3026_v21, 0.0 }
 0x50b   :  { %v1501_v6 = vadd.f32 %v2230_v51, %v3202_v14  ;;  %v1492_v1 = vpop.f32.mrb[43].mxu1  ;;  %v1582_v31 = vadd.f32 %v1498_v13, %v3343_v42  ;;  %v3355_v42 = vmax.f32 %v3036_v34, 0.0 }
 0x50c   :  { %v1493_v33 = vadd.f32 %v1492_v1, %v3202_v14  ;;  %v1580_v11 = vadd.f32 %v1490_v35, %v3345_v44 }
 0x50d   :  { %v1583_v61 = vadd.f32 %v1501_v6, %v3344_v54 }
 0x50e   :  { %v1581_v7 = vadd.f32 %v1493_v33, %v3346_v55 }
 0x50f   :  { %v1920_v18 = vpack.c.bf16 %v1583_v61, %v1582_v31  ;;  %v3356_v31 = vmax.f32 %v3038_v30, 0.0  ;;  %v3357_v61 = vmax.f32 %v3032_v24, 0.0 }
 0x510   :  { %v1915_v45 = vpack.c.bf16 %v1581_v7, %v1580_v11  ;;  %v2233_v17 = vpop.f32.mrb[44].mxu1  ;;  %v3358_v11 = vmax.f32 %v3034_v28, 0.0 }
 0x511   :  { %1968 = vst [vmem:[#allocation2 + $0x38] sm:$0xff] %v1920_v18   ;;  %v1514_v43 = vadd.f32 %v2233_v17, %v3202_v14  ;;  %v1505_v3 = vpop.f32.mrb[45].mxu1 }
 0x512   :  { %1967 = vst [vmem:[#allocation2 + $0x30] sm:$0xff] %v1915_v45   ;;  %v1506_v50 = vadd.f32 %v1505_v3, %v3202_v14  ;;  %v2234_v26 = vpop.f32.mrb[46].mxu1 }
 0x513   :  { %v1517_v58 = vadd.f32 %v2234_v26, %v3202_v14  ;;  %v1508_v0 = vpop.f32.mrb[47].mxu1  ;;  %v1586_v53 = vadd.f32 %v1514_v43, %v3347_v41  ;;  %v3359_v26 = vmax.f32 %v3042_v62, 0.0 }
 0x514   :  { %v1509_v48 = vadd.f32 %v1508_v0, %v3202_v14  ;;  %v1584_v20 = vadd.f32 %v1506_v50, %v3349_v56 }
 0x515   :  { %v1587_v10 = vadd.f32 %v1517_v58, %v3348_v38  ;;  %v3360_v58 = vmax.f32 %v3044_v36, 0.0 }
 0x516   :  { %v1585_v49 = vadd.f32 %v1509_v48, %v3350_v63  ;;  %v3361_v48 = vmax.f32 %v3040_v32, 0.0 }
 0x517   :  { %v1930_v22 = vpack.c.bf16 %v1587_v10, %v1586_v53  ;;  %v3362_v53 = vmax.f32 %v2971_v15, 0.0 }
 0x518   :  { %v1925_v40 = vpack.c.bf16 %v1585_v49, %v1584_v20  ;;  %v2237_v25 = vpop.f32.mrb[48].mxu1 }
 0x519   :  { %1970 = vst [vmem:[#allocation2 + $0x48] sm:$0xff] %v1930_v22   ;;  %v1530_v47 = vadd.f32 %v2237_v25, %v3202_v14  ;;  %v1521_v23 = vpop.f32.mrb[49].mxu1 }
 0x51a   :  { %1969 = vst [vmem:[#allocation2 + $0x40] sm:$0xff] %v1925_v40   ;;  %v1522_v59 = vadd.f32 %v1521_v23, %v3202_v14  ;;  %v2238_v27 = vpop.f32.mrb[50].mxu1 }
 0x51b   :  { %v1533_v8 = vadd.f32 %v2238_v27, %v3202_v14  ;;  %v1524_v37 = vpop.f32.mrb[51].mxu1  ;;  %v1590_v5 = vadd.f32 %v1530_v47, %v3351_v46 }
 0x51c   :  { %v1525_v2 = vadd.f32 %v1524_v37, %v3202_v14  ;;  %v1588_v9 = vadd.f32 %v1522_v59, %v3353_v52 }
 0x51d   :  { %v1591_v60 = vadd.f32 %v1533_v8, %v3352_v4 }
 0x51e   :  { %v1589_v57 = vadd.f32 %v1525_v2, %v3354_v16 }
 0x51f   :  { %v1940_v13 = vpack.c.bf16 %v1591_v60, %v1590_v5 }
 0x520   :  { %v1935_v39 = vpack.c.bf16 %v1589_v57, %v1588_v9  ;;  %v2241_v35 = vpop.f32.mrb[52].mxu1 }
 0x521   :  { %1972 = vst [vmem:[#allocation2 + $0x58] sm:$0xff] %v1940_v13   ;;  %v1546_v51 = vadd.f32 %v2241_v35, %v3202_v14  ;;  %v1537_v6 = vpop.f32.mrb[53].mxu1 }
 0x522   :  { %1971 = vst [vmem:[#allocation2 + $0x50] sm:$0xff] %v1935_v39   ;;  %v1538_v19 = vadd.f32 %v1537_v6, %v3202_v14  ;;  %v2242_v1 = vpop.f32.mrb[54].mxu1 }
 0x523   :  { %v1549_v29 = vadd.f32 %v2242_v1, %v3202_v14  ;;  %v1540_v33 = vpop.f32.mrb[55].mxu1  ;;  %v1594_v21 = vadd.f32 %v1546_v51, %v3355_v42 }
 0x524   :  { %v1541_v12 = vadd.f32 %v1540_v33, %v3202_v14  ;;  %v1592_v44 = vadd.f32 %v1538_v19, %v3357_v61 }
 0x525   :  { %v1595_v54 = vadd.f32 %v1549_v29, %v3356_v31 }
 0x526   :  { %v1593_v55 = vadd.f32 %v1541_v12, %v3358_v11 }
 0x527   :  { %v1950_v7 = vpack.c.bf16 %v1595_v54, %v1594_v21 }
 0x528   :  { %v1945_v18 = vpack.c.bf16 %v1593_v55, %v1592_v44  ;;  %v2245_v45 = vpop.f32.mrb[56].mxu1 }
 0x529   :  { %1974 = vst [vmem:[#allocation2 + $0x68] sm:$0xff] %v1950_v7   ;;  %v1562_v17 = vadd.f32 %v2245_v45, %v3202_v14  ;;  %v1553_v43 = vpop.f32.mrb[57].mxu1 }
 0x52a   :  { %1973 = vst [vmem:[#allocation2 + $0x60] sm:$0xff] %v1945_v18   ;;  %v1554_v34 = vadd.f32 %v1553_v43, %v3202_v14  ;;  %v2246_v3 = vpop.f32.mrb[58].mxu1 }
 0x52b   :  { %v1565_v30 = vadd.f32 %v2246_v3, %v3202_v14  ;;  %v1556_v50 = vpop.f32.mrb[59].mxu1  ;;  %v1598_v28 = vadd.f32 %v1562_v17, %v3359_v26 }
 0x52c   :  { %v1557_v24 = vadd.f32 %v1556_v50, %v3202_v14  ;;  %v1596_v41 = vadd.f32 %v1554_v34, %v3361_v48 }
 0x52d   :  { %v1599_v0 = vadd.f32 %v1565_v30, %v3360_v58 }
 0x52e   :  { %v1597_v38 = vadd.f32 %v1557_v24, %v3362_v53 }
 0x52f   :  { %v1960_v10 = vpack.c.bf16 %v1599_v0, %v1598_v28 }
 0x530   :  { %v1955_v56 = vpack.c.bf16 %v1597_v38, %v1596_v41 }
 0x531   :  { %1976 = vst [vmem:[#allocation2 + $0x78] sm:$0xff] %v1960_v10  }
 0x532   :  { %1975 = vst [vmem:[#allocation2 + $0x70] sm:$0xff] %v1955_v56  }
 0x533   :  { %2308 = shalt.err (!%p2305_p4)
}
 0x534   :  { %s2309_s0 = scalar_lea.hbm %s3318_s6, 2048 }
 0x535   :  { %p2310_p5 = scmp.ne.s32.totalorder %s3318_s6, %s2309_s0  ;;  %p2313_p6 = scmp.lt.u32.totalorder %s2309_s0, %s3318_s6 }
 0x537   :  { %p2315_p7 = pnand %p2313_p6, %p2310_p5 }
 0x539   :  { %2318 = shalt.err (!%p2315_p7)
}
 0x53a   :  { %s2322_s18 = smov 64   ;;  %s2323_s19 = smov 4  }
 0x53b   :  { %1771 = dma.vmem_to_hbm [thread:$0]  %s1766_s5, 2048, %s3318_s6, [#allocation3], %s2322_s18, %s2322_s18, %s2323_s19  }
 0x53c   :  { %2319 = dma.done.wait [#allocation3], 2048  }
 0x53d   :  { %2320 = vsyncadd [#allocation3], 4294965248 }
 0x53e   :  { %1775 = vsyncpa [#allocation3], 1 }

</bundles_post_ra>
